<compile_context>
chip_gen: v7x
topology: tpu7x:2x2x1
jax: 0.10.0
libtpu: 0.0.40
codegen_flags: <defaults>
</compile_context>

<pallas_src>
import jax
import jax.numpy as jnp
from jax.experimental import pallas as pl
from jax.experimental.pallas import tpu as pltpu

LN_EPS = 1e-5

# Row indices inside the packed [16, n_embed] parameter-vector array.
_ROW_LN0W, _ROW_LN0B = 0, 1
_ROW_LN1W, _ROW_LN1B = 2, 3
_ROW_LN2W, _ROW_LN2B = 4, 5
_ROW_NEG_EXP_TD = 6          # precomputed -exp(att_time_decay)
_ROW_TF = 7                  # att_time_first
_ROW_A_TMK, _ROW_A_TMV, _ROW_A_TMR = 8, 9, 10
_ROW_F_TMK, _ROW_F_TMR = 11, 12
_NUM_VEC_ROWS = 16           # padded to a sublane multiple


def _layernorm(h, w, b):
    # E[x^2] - E[x]^2: the two lane reductions are independent (overlap on XLU).
    mu = jnp.mean(h, axis=-1, keepdims=True)
    m2 = jnp.mean(h * h, axis=-1, keepdims=True)
    var = m2 - mu * mu
    return (h - mu) * jax.lax.rsqrt(var + LN_EPS) * w + b


def _stream_tiles(w_hbm_ref, buf_ref, sem_ref, n_tiles, compute_tile,
                  first_started=False):
    """Double-buffered HBM->VMEM weight stream; DMA of tile t+1 overlaps
    compute on tile t. Tile indices are static Python ints."""
    def cp(t, slot):
        return pltpu.make_async_copy(w_hbm_ref.at[t], buf_ref.at[slot],
                                     sem_ref.at[slot])
    if not first_started:
        cp(0, 0).start()
    for t in range(n_tiles):
        slot = t % 2
        if t + 1 < n_tiles:
            cp(t + 1, 1 - slot).start()
        cp(t, slot).wait()
        compute_tile(t, slot)


def _make_kernel(B, C, F, TN, apply_ln0):
    nC = C // TN
    nF = F // TN
    f32 = jnp.float32
    bf16 = jnp.bfloat16

    def kernel(vec_ref, x_ref, sA_ref, sB_ref, sp_ref, sx_ref, sffn_ref,
               w_kvr_ref, w_out_ref, w_fk_ref, w_frv_ref,
               xo_ref, nA_ref, nB_ref, np_ref, nx_ref, nffn_ref,
               buf_kvr, buf_out, buf_fk, buf_frv,
               rwkv_s, x1_s, kk_s,
               sem_kvr, sem_out, sem_fk, sem_frv):

        def vrow(i):                                   # load near use site
            return vec_ref[i:i + 1, :]

        # Kick off the first weight tile of every phase up front so the HBM
        # stream for later phases hides under earlier compute.
        pltpu.make_async_copy(w_kvr_ref.at[0], buf_kvr.at[0], sem_kvr.at[0]).start()
        pltpu.make_async_copy(w_out_ref.at[0], buf_out.at[0], sem_out.at[0]).start()
        pltpu.make_async_copy(w_fk_ref.at[0], buf_fk.at[0], sem_fk.at[0]).start()
        pltpu.make_async_copy(w_frv_ref.at[0], buf_frv.at[0], sem_frv.at[0]).start()

        x = x_ref[...]
        if apply_ln0:                                  # layer_id == 0 only
            x = _layernorm(x, vrow(_ROW_LN0W), vrow(_ROW_LN0B))

        # ---------------- RWKV_TimeMix: k/v/r projections + WKV -------------
        xn = _layernorm(x, vrow(_ROW_LN1W), vrow(_ROW_LN1B))
        sx = sx_ref[...]                               # read BEFORE nx write
        d = xn - sx                                    # shared by the 3 mixes
        xk = (sx + vrow(_ROW_A_TMK) * d).astype(bf16)  # == xn*tmk + sx*(1-tmk)
        xv = (sx + vrow(_ROW_A_TMV) * d).astype(bf16)
        xr = (sx + vrow(_ROW_A_TMR) * d).astype(bf16)

        def att_tile(t, slot):
            c0 = t * TN
            wk = buf_kvr[slot, :, 0:TN]
            wv = buf_kvr[slot, :, TN:2 * TN]
            wr = buf_kvr[slot, :, 2 * TN:3 * TN]
            k = jnp.dot(xk, wk, preferred_element_type=f32)
            v = jnp.dot(xv, wv, preferred_element_type=f32)
            r = jax.nn.sigmoid(jnp.dot(xr, wr, preferred_element_type=f32))

            sA = sA_ref[:, c0:c0 + TN]
            sB = sB_ref[:, c0:c0 + TN]
            sp = sp_ref[:, c0:c0 + TN]
            tf = vec_ref[_ROW_TF:_ROW_TF + 1, c0:c0 + TN]
            ntd = vec_ref[_ROW_NEG_EXP_TD:_ROW_NEG_EXP_TD + 1, c0:c0 + TN]

            ww = tf + k
            p = jnp.maximum(sp, ww)
            e1 = jnp.exp(sp - p)
            e2 = jnp.exp(ww - p)
            a = e1 * sA + e2 * v
            b = e1 * sB + e2

            ww2 = sp + ntd                             # -exp(time_decay) precomputed
            p2 = jnp.maximum(ww2, k)
            f1 = jnp.exp(ww2 - p2)
            f2 = jnp.exp(k - p2)
            nA_ref[:, c0:c0 + TN] = f1 * sA + f2 * v
            nB_ref[:, c0:c0 + TN] = f1 * sB + f2
            np_ref[:, c0:c0 + TN] = p2

            rwkv_s[:, c0:c0 + TN] = r * a * pl.reciprocal(b, approx=True)

        _stream_tiles(w_kvr_ref, buf_kvr, sem_kvr, nC, att_tile, first_started=True)

        # ---------------- attention output projection + residual ------------
        rwkv = rwkv_s[...].astype(bf16)

        def out_tile(t, slot):
            c0 = t * TN
            x1_s[:, c0:c0 + TN] = x[:, c0:c0 + TN] + jnp.dot(
                rwkv, buf_out[slot], preferred_element_type=f32)

        _stream_tiles(w_out_ref, buf_out, sem_out, nC, out_tile, first_started=True)

        # ---------------- RWKV_ChannelMix: key projection --------------------
        x1 = x1_s[...]
        xn2 = _layernorm(x1, vrow(_ROW_LN2W), vrow(_ROW_LN2B))
        sffn = sffn_ref[...]                           # read BEFORE nffn write
        d2 = xn2 - sffn
        fxk = (sffn + vrow(_ROW_F_TMK) * d2).astype(bf16)
        fxr = (sffn + vrow(_ROW_F_TMR) * d2).astype(bf16)

        def fk_tile(t, slot):
            f0 = t * TN
            kk_s[:, f0:f0 + TN] = jnp.square(jnp.maximum(
                jnp.dot(fxk, buf_fk[slot], preferred_element_type=f32), 0.0))

        _stream_tiles(w_fk_ref, buf_fk, sem_fk, nF, fk_tile, first_started=True)

        # ---------------- ChannelMix: receptance + value + residual ----------
        kk = kk_s[...].astype(bf16)

        def frv_tile(t, slot):
            c0 = t * TN
            wr = buf_frv[slot, 0:C, :]
            wv = buf_frv[slot, C:C + F, :]
            rr = jax.nn.sigmoid(jnp.dot(fxr, wr, preferred_element_type=f32))
            kv = jnp.dot(kk, wv, preferred_element_type=f32)
            xo_ref[:, c0:c0 + TN] = x1[:, c0:c0 + TN] + rr * kv

        _stream_tiles(w_frv_ref, buf_frv, sem_frv, nC, frv_tile, first_started=True)

        # Aliased-state outputs written last (after all reads of sx/sffn).
        nx_ref[...] = xn                               # new_x  (= ln1 output)
        nffn_ref[...] = xn2                            # new_ffn(= ln2 output)

    return kernel


# ----------------------------- host-side prep --------------------------------
def _tile_cols(w, tn):
    """[K, N] -> [N//tn, K, tn]; each leading-dim entry is one contiguous
    column tile ready for a single DMA."""
    K, N = w.shape
    nt = N // tn
    return jnp.transpose(w.reshape(K, nt, tn), (1, 0, 2))


def _pick_tile_n(C, F, max_buf_bytes=12 * 1024 * 1024):
    # Largest lane-aligned tile that divides both C and F while keeping the
    # biggest double buffer (ffn r|v: 2*(C+F)*TN bf16) under ~12 MiB.
    for tn in (512, 256, 128):
        if C % tn == 0 and F % tn == 0 and 2 * (C + F) * tn * 2 <= max_buf_bytes:
            return tn
    for tn in (128, 256, 512):
        if C % tn == 0 and F % tn == 0:
            return tn
    raise ValueError("n_embed and ffn_dim must share a multiple-of-128 tile")


def prepare_params(params, tile_n=None):
    """One-time host-side transform: pack the 13 [1, C] vectors into one
    [16, C] f32 array (with -exp(time_decay) precomputed) and pre-tile /
    pack the 7 weight matrices into 4 bf16 HBM streams."""
    C = params["ln0_w"].shape[-1]
    F = params["ffn_key_wT"].shape[1]
    tn = tile_n or _pick_tile_n(C, F)

    rows = [
        params["ln0_w"], params["ln0_b"],
        params["ln1_w"], params["ln1_b"],
        params["ln2_w"], params["ln2_b"],
        -jnp.exp(params["att_time_decay"]),
        params["att_time_first"],
        params["att_time_mix_k"], params["att_time_mix_v"], params["att_time_mix_r"],
        params["ffn_time_mix_k"], params["ffn_time_mix_r"],
    ]
    packed = jnp.concatenate([r.reshape(1, C).astype(jnp.float32) for r in rows], axis=0)
    pad = jnp.zeros((_NUM_VEC_ROWS - packed.shape[0], C), jnp.float32)
    packed_vec = jnp.concatenate([packed, pad], axis=0)

    bf = lambda name: params[name].astype(jnp.bfloat16)
    # att Wk|Wv|Wr packed per column tile -> one DMA stream feeds 3 matmuls.
    w_kvr = jnp.concatenate(
        [_tile_cols(bf("att_key_wT"), tn),
         _tile_cols(bf("att_value_wT"), tn),
         _tile_cols(bf("att_receptance_wT"), tn)], axis=2)      # [nC, C, 3*tn]
    w_out = _tile_cols(bf("att_output_wT"), tn)                 # [nC, C, tn]
    w_fk = _tile_cols(bf("ffn_key_wT"), tn)                     # [nF, C, tn]
    # ffn receptance (C rows) stacked over ffn value (F rows) per output tile.
    w_frv = jnp.concatenate(
        [_tile_cols(bf("ffn_receptance_wT"), tn),
         _tile_cols(bf("ffn_value_wT"), tn)], axis=1)           # [nC, C+F, tn]
    return packed_vec, (w_kvr, w_out, w_fk, w_frv)


def block_onnx_pallas(x, state_A, state_B, state_p, state_x, state_ffn,
                      packed_vec, packed_weights, *, layer_id=0, alias_states=True):
    w_kvr, w_out, w_fk, w_frv = packed_weights
    B, C = x.shape
    TN = w_kvr.shape[2] // 3
    F = w_fk.shape[0] * TN

    kernel = _make_kernel(B, C, F, TN, apply_ln0=(layer_id == 0))

    out_shapes = tuple(jax.ShapeDtypeStruct((B, C), jnp.float32) for _ in range(6))

    vmem = pl.BlockSpec(memory_space=pltpu.MemorySpace.VMEM)
    hbm = pl.BlockSpec(memory_space=pl.ANY)
    in_specs = [vmem] * 7 + [hbm] * 4
    out_specs = tuple(pl.BlockSpec(memory_space=pltpu.MemorySpace.VMEM)
                      for _ in range(6))

    scratch_shapes = [
        pltpu.VMEM((2, C, 3 * TN), jnp.bfloat16),   # att k|v|r weight stream
        pltpu.VMEM((2, C, TN), jnp.bfloat16),       # att output weight stream
        pltpu.VMEM((2, C, TN), jnp.bfloat16),       # ffn key weight stream
        pltpu.VMEM((2, C + F, TN), jnp.bfloat16),   # ffn r|v weight stream
        pltpu.VMEM((B, C), jnp.float32),            # rwkv
        pltpu.VMEM((B, C), jnp.float32),            # x after attention
        pltpu.VMEM((B, F), jnp.float32),            # kk
        pltpu.SemaphoreType.DMA((2,)),
        pltpu.SemaphoreType.DMA((2,)),
        pltpu.SemaphoreType.DMA((2,)),
        pltpu.SemaphoreType.DMA((2,)),
    ]

    # Alias recurrent-state (and x) HBM buffers onto the corresponding outputs
    # so a decode loop can donate and update state in place.
    io_aliases = {1: 0, 2: 1, 3: 2, 4: 3, 5: 4, 6: 5} if alias_states else {}

    # VMEM budget: generation-aware limit, capped well under physical capacity.
    buf_bytes = (2 * C * 3 * TN + 2 * 2 * C * TN + 2 * (C + F) * TN) * 2
    act_bytes = (2 * B * C + B * F) * 4
    io_bytes = (16 * C + 13 * B * C) * 4
    needed = buf_bytes + act_bytes + io_bytes
    try:
        vmem_cap = int(pltpu.get_tpu_info().vmem_capacity_bytes)
    except Exception:  # pragma: no cover - conservative fallback (v7x size)
        vmem_cap = 64 * 1024 * 1024
    vmem_limit = None
    if needed > 12 * 1024 * 1024:
        vmem_limit = min(max(2 * needed, 32 * 1024 * 1024), int(0.78 * vmem_cap))

    weight_bytes = sum(int(w.size) * w.dtype.itemsize for w in packed_weights)
    cost = pl.CostEstimate(
        flops=2 * B * (5 * C * C + 2 * C * F),
        transcendentals=8 * B * C + 2 * B * F,
        bytes_accessed=weight_bytes + io_bytes + act_bytes,
    )

    return pl.pallas_call(
        kernel,
        out_shape=out_shapes,
        in_specs=in_specs,
        out_specs=out_specs,
        scratch_shapes=scratch_shapes,
        input_output_aliases=io_aliases,
        compiler_params=pltpu.CompilerParams(vmem_limit_bytes=vmem_limit),
        cost_estimate=cost,
    )(packed_vec, x, state_A, state_B, state_p, state_x, state_ffn,
      w_kvr, w_out, w_fk, w_frv)


# ---------------- pure-JAX reference (mirrors the PyTorch forward) -----------
def block_onnx_ref(x, sA, sB, sp, sx, sffn, p):
    def ln(h, w, b):
        mu = jnp.mean(h, axis=-1, keepdims=True)
        var = jnp.mean((h - mu) ** 2, axis=-1, keepdims=True)
        return (h - mu) / jnp.sqrt(var + LN_EPS) * w + b

    def mm(a, w):  # same bf16-weight / f32-accumulate precision as the kernel
        return jnp.dot(a.astype(jnp.bfloat16), w.astype(jnp.bfloat16),
                       preferred_element_type=jnp.float32)

    x = ln(x, p["ln0_w"], p["ln0_b"])
    short = x
    xn = ln(x, p["ln1_w"], p["ln1_b"])
    xk = xn * p["att_time_mix_k"] + sx * (1 - p["att_time_mix_k"])
    xv = xn * p["att_time_mix_v"] + sx * (1 - p["att_time_mix_v"])
    xr = xn * p["att_time_mix_r"] + sx * (1 - p["att_time_mix_r"])
    new_x = xn
    k = mm(xk, p["att_key_wT"])
    v = mm(xv, p["att_value_wT"])
    r = jax.nn.sigmoid(mm(xr, p["att_receptance_wT"]))
    ww = p["att_time_first"] + k
    pp = jnp.maximum(sp, ww)
    e1, e2 = jnp.exp(sp - pp), jnp.exp(ww - pp)
    a = e1 * sA + e2 * v
    b = e1 * sB + e2
    ww = sp + (-jnp.exp(p["att_time_decay"]))
    pp = jnp.maximum(ww, k)
    e1, e2 = jnp.exp(ww - pp), jnp.exp(k - pp)
    new_A = e1 * sA + e2 * v
    new_B = e1 * sB + e2
    new_p = pp
    x = short + mm(r * a / b, p["att_output_wT"])
    short = x
    xn = ln(x, p["ln2_w"], p["ln2_b"])
    xk = xn * p["ffn_time_mix_k"] + sffn * (1 - p["ffn_time_mix_k"])
    xr = xn * p["ffn_time_mix_r"] + sffn * (1 - p["ffn_time_mix_r"])
    new_ffn = xn
    rr = jax.nn.sigmoid(mm(xr, p["ffn_receptance_wT"]))
    kk = jnp.square(jnp.maximum(mm(xk, p["ffn_key_wT"]), 0.0))
    x = short + rr * mm(kk, p["ffn_value_wT"])
    return x, new_A, new_B, new_p, new_x, new_ffn


def make_params(key, n_embed, ffn_dim):
    ks = jax.random.split(key, 16)
    f32 = jnp.float32
    scale = 0.02
    return {
        "ln0_w": jnp.ones((1, n_embed), f32) + 0.01 * jax.random.normal(ks[0], (1, n_embed), f32),
        "ln0_b": 0.01 * jax.random.normal(ks[1], (1, n_embed), f32),
        "ln1_w": jnp.ones((1, n_embed), f32) + 0.01 * jax.random.normal(ks[2], (1, n_embed), f32),
        "ln1_b": 0.01 * jax.random.normal(ks[3], (1, n_embed), f32),
        "ln2_w": jnp.ones((1, n_embed), f32) + 0.01 * jax.random.normal(ks[4], (1, n_embed), f32),
        "ln2_b": 0.01 * jax.random.normal(ks[5], (1, n_embed), f32),
        "att_time_decay": jnp.full((1, n_embed), -0.5, f32),
        "att_time_first": jnp.full((1, n_embed), jnp.log(0.3), f32),
        "att_time_mix_k": jax.random.uniform(ks[6], (1, n_embed), f32),
        "att_time_mix_v": jax.random.uniform(ks[7], (1, n_embed), f32),
        "att_time_mix_r": jax.random.uniform(ks[8], (1, n_embed), f32),
        # Linear weights, pre-transposed to [in, out]
        "att_key_wT": scale * jax.random.normal(ks[9], (n_embed, n_embed), f32),
        "att_value_wT": scale * jax.random.normal(ks[10], (n_embed, n_embed), f32),
        "att_receptance_wT": scale * jax.random.normal(ks[11], (n_embed, n_embed), f32),
        "att_output_wT": scale * jax.random.normal(ks[12], (n_embed, n_embed), f32),
        "ffn_time_mix_k": jax.random.uniform(ks[13], (1, n_embed), f32),
        "ffn_time_mix_r": jax.random.uniform(ks[14], (1, n_embed), f32),
        "ffn_key_wT": scale * jax.random.normal(ks[15], (n_embed, ffn_dim), f32),
        "ffn_receptance_wT": scale * jax.random.normal(ks[0], (n_embed, n_embed), f32),
        "ffn_value_wT": scale * jax.random.normal(ks[1], (ffn_dim, n_embed), f32),
    }


if __name__ == "__main__":
    B, n_embed, ffn_dim = 8, 128, 512

    key = jax.random.PRNGKey(0)
    k_in, k_par = jax.random.split(key)
    kx, kA, kB, kp, ksx, kffn = jax.random.split(k_in, 6)

    x = jax.random.normal(kx, (B, n_embed), jnp.float32)
    state_A = jax.random.normal(kA, (B, n_embed), jnp.float32)
    # The WKV "b" accumulator is a sum of exponentials in real inference:
    # keep the test state positive so r*a/b is well conditioned.
    state_B = jnp.abs(jax.random.normal(kB, (B, n_embed), jnp.float32)) + 1.0
    state_p = jax.random.normal(kp, (B, n_embed), jnp.float32)
    state_x = jax.random.normal(ksx, (B, n_embed), jnp.float32)
    state_ffn = jax.random.normal(kffn, (B, n_embed), jnp.float32)

    params = make_params(k_par, n_embed, ffn_dim)
    packed_vec, packed_weights = prepare_params(params)

    # Compute the reference BEFORE the kernel call: with input_output_aliases
    # the x/state input buffers may be aliased/overwritten by the kernel.
    refs = block_onnx_ref(x, state_A, state_B, state_p, state_x, state_ffn, params)
    refs = jax.block_until_ready(refs)

    outs = block_onnx_pallas(x, state_A, state_B, state_p, state_x, state_ffn,
                             packed_vec, packed_weights, layer_id=0)
    outs = jax.block_until_ready(outs)

    for o, r in zip(outs, refs):
        err = float(jnp.max(jnp.abs(o - r)))
        assert jnp.allclose(o, r, rtol=1e-2, atol=1e-2), err

    print("KERNEL_OK")
</pallas_src>

<mosaic_0001>
module attributes {stable_mosaic.version = 11 : i64} {
  func.func @kernel(%arg0: memref<16x128xf32, #tpu.memory_space<vmem>>, %arg1: memref<8x128xf32, #tpu.memory_space<vmem>>, %arg2: memref<8x128xf32, #tpu.memory_space<vmem>>, %arg3: memref<8x128xf32, #tpu.memory_space<vmem>>, %arg4: memref<8x128xf32, #tpu.memory_space<vmem>>, %arg5: memref<8x128xf32, #tpu.memory_space<vmem>>, %arg6: memref<8x128xf32, #tpu.memory_space<vmem>>, %arg7: memref<1x128x384xbf16, #tpu.memory_space<any>>, %arg8: memref<1x128x128xbf16, #tpu.memory_space<any>>, %arg9: memref<4x128x128xbf16, #tpu.memory_space<any>>, %arg10: memref<1x640x128xbf16, #tpu.memory_space<any>>, %arg11: memref<8x128xf32, #tpu.memory_space<vmem>>, %arg12: memref<8x128xf32, #tpu.memory_space<vmem>>, %arg13: memref<8x128xf32, #tpu.memory_space<vmem>>, %arg14: memref<8x128xf32, #tpu.memory_space<vmem>>, %arg15: memref<8x128xf32, #tpu.memory_space<vmem>>, %arg16: memref<8x128xf32, #tpu.memory_space<vmem>>, %arg17: memref<2x128x384xbf16, #tpu.memory_space<vmem>>, %arg18: memref<2x128x128xbf16, #tpu.memory_space<vmem>>, %arg19: memref<2x128x128xbf16, #tpu.memory_space<vmem>>, %arg20: memref<2x640x128xbf16, #tpu.memory_space<vmem>>, %arg21: memref<8x128xf32, #tpu.memory_space<vmem>>, %arg22: memref<8x128xf32, #tpu.memory_space<vmem>>, %arg23: memref<8x512xf32, #tpu.memory_space<vmem>>, %arg24: memref<2x!tpu.dma_semaphore, #tpu.memory_space<semaphore_mem>>, %arg25: memref<2x!tpu.dma_semaphore, #tpu.memory_space<semaphore_mem>>, %arg26: memref<2x!tpu.dma_semaphore, #tpu.memory_space<semaphore_mem>>, %arg27: memref<2x!tpu.dma_semaphore, #tpu.memory_space<semaphore_mem>>) attributes {dimension_semantics = [], scalar_prefetch = 0 : i64, scratch_operands = 11 : i64, tpu.core_type = #tpu.core_type<tc>} {
    %c0_i32 = arith.constant 0 : i32
    %c0_i32_0 = arith.constant 0 : i32
    %c0_i32_1 = arith.constant 0 : i32
    %c0_i32_2 = arith.constant 0 : i32
    %c0_i32_3 = arith.constant 0 : i32
    %0 = tpu.memref_slice %arg7[%c0_i32, %c0_i32_2, %c0_i32_3] : memref<1x128x384xbf16, #tpu.memory_space<any>> -> memref<1x128x384xbf16, #tpu.memory_space<any>>
    %1 = tpu.memref_squeeze %0 : memref<1x128x384xbf16, #tpu.memory_space<any>> -> memref<128x384xbf16, #tpu.memory_space<any>>
    %c0_i32_4 = arith.constant 0 : i32
    %c0_i32_5 = arith.constant 0 : i32
    %2 = tpu.memref_slice %arg17[%c0_i32_0, %c0_i32_4, %c0_i32_5] : memref<2x128x384xbf16, #tpu.memory_space<vmem>> -> memref<1x128x384xbf16, #tpu.memory_space<vmem>>
    %3 = tpu.memref_squeeze %2 : memref<1x128x384xbf16, #tpu.memory_space<vmem>> -> memref<128x384xbf16, #tpu.memory_space<vmem>>
    %4 = tpu.memref_slice %arg24[%c0_i32_1] : memref<2x!tpu.dma_semaphore, #tpu.memory_space<semaphore_mem>> -> memref<1x!tpu.dma_semaphore, #tpu.memory_space<semaphore_mem>>
    %5 = tpu.memref_squeeze %4 : memref<1x!tpu.dma_semaphore, #tpu.memory_space<semaphore_mem>> -> memref<!tpu.dma_semaphore, #tpu.memory_space<semaphore_mem>>
    tpu.enqueue_dma source(%1 : memref<128x384xbf16, #tpu.memory_space<any>>) target(%3 : memref<128x384xbf16, #tpu.memory_space<vmem>>) target_semaphore(%5 : memref<!tpu.dma_semaphore, #tpu.memory_space<semaphore_mem>>)
    %c0_i32_6 = arith.constant 0 : i32
    %c0_i32_7 = arith.constant 0 : i32
    %c0_i32_8 = arith.constant 0 : i32
    %c0_i32_9 = arith.constant 0 : i32
    %c0_i32_10 = arith.constant 0 : i32
    %6 = tpu.memref_slice %arg8[%c0_i32_6, %c0_i32_9, %c0_i32_10] : memref<1x128x128xbf16, #tpu.memory_space<any>> -> memref<1x128x128xbf16, #tpu.memory_space<any>>
    %7 = tpu.memref_squeeze %6 : memref<1x128x128xbf16, #tpu.memory_space<any>> -> memref<128x128xbf16, #tpu.memory_space<any>>
    %c0_i32_11 = arith.constant 0 : i32
    %c0_i32_12 = arith.constant 0 : i32
    %8 = tpu.memref_slice %arg18[%c0_i32_7, %c0_i32_11, %c0_i32_12] : memref<2x128x128xbf16, #tpu.memory_space<vmem>> -> memref<1x128x128xbf16, #tpu.memory_space<vmem>>
    %9 = tpu.memref_squeeze %8 : memref<1x128x128xbf16, #tpu.memory_space<vmem>> -> memref<128x128xbf16, #tpu.memory_space<vmem>>
    %10 = tpu.memref_slice %arg25[%c0_i32_8] : memref<2x!tpu.dma_semaphore, #tpu.memory_space<semaphore_mem>> -> memref<1x!tpu.dma_semaphore, #tpu.memory_space<semaphore_mem>>
    %11 = tpu.memref_squeeze %10 : memref<1x!tpu.dma_semaphore, #tpu.memory_space<semaphore_mem>> -> memref<!tpu.dma_semaphore, #tpu.memory_space<semaphore_mem>>
    tpu.enqueue_dma source(%7 : memref<128x128xbf16, #tpu.memory_space<any>>) target(%9 : memref<128x128xbf16, #tpu.memory_space<vmem>>) target_semaphore(%11 : memref<!tpu.dma_semaphore, #tpu.memory_space<semaphore_mem>>)
    %c0_i32_13 = arith.constant 0 : i32
    %c0_i32_14 = arith.constant 0 : i32
    %c0_i32_15 = arith.constant 0 : i32
    %c0_i32_16 = arith.constant 0 : i32
    %c0_i32_17 = arith.constant 0 : i32
    %12 = tpu.memref_slice %arg9[%c0_i32_13, %c0_i32_16, %c0_i32_17] : memref<4x128x128xbf16, #tpu.memory_space<any>> -> memref<1x128x128xbf16, #tpu.memory_space<any>>
    %13 = tpu.memref_squeeze %12 : memref<1x128x128xbf16, #tpu.memory_space<any>> -> memref<128x128xbf16, #tpu.memory_space<any>>
    %c0_i32_18 = arith.constant 0 : i32
    %c0_i32_19 = arith.constant 0 : i32
    %14 = tpu.memref_slice %arg19[%c0_i32_14, %c0_i32_18, %c0_i32_19] : memref<2x128x128xbf16, #tpu.memory_space<vmem>> -> memref<1x128x128xbf16, #tpu.memory_space<vmem>>
    %15 = tpu.memref_squeeze %14 : memref<1x128x128xbf16, #tpu.memory_space<vmem>> -> memref<128x128xbf16, #tpu.memory_space<vmem>>
    %16 = tpu.memref_slice %arg26[%c0_i32_15] : memref<2x!tpu.dma_semaphore, #tpu.memory_space<semaphore_mem>> -> memref<1x!tpu.dma_semaphore, #tpu.memory_space<semaphore_mem>>
    %17 = tpu.memref_squeeze %16 : memref<1x!tpu.dma_semaphore, #tpu.memory_space<semaphore_mem>> -> memref<!tpu.dma_semaphore, #tpu.memory_space<semaphore_mem>>
    tpu.enqueue_dma source(%13 : memref<128x128xbf16, #tpu.memory_space<any>>) target(%15 : memref<128x128xbf16, #tpu.memory_space<vmem>>) target_semaphore(%17 : memref<!tpu.dma_semaphore, #tpu.memory_space<semaphore_mem>>)
    %c0_i32_20 = arith.constant 0 : i32
    %c0_i32_21 = arith.constant 0 : i32
    %c0_i32_22 = arith.constant 0 : i32
    %c0_i32_23 = arith.constant 0 : i32
    %c0_i32_24 = arith.constant 0 : i32
    %18 = tpu.memref_slice %arg10[%c0_i32_20, %c0_i32_23, %c0_i32_24] : memref<1x640x128xbf16, #tpu.memory_space<any>> -> memref<1x640x128xbf16, #tpu.memory_space<any>>
    %19 = tpu.memref_squeeze %18 : memref<1x640x128xbf16, #tpu.memory_space<any>> -> memref<640x128xbf16, #tpu.memory_space<any>>
    %c0_i32_25 = arith.constant 0 : i32
    %c0_i32_26 = arith.constant 0 : i32
    %20 = tpu.memref_slice %arg20[%c0_i32_21, %c0_i32_25, %c0_i32_26] : memref<2x640x128xbf16, #tpu.memory_space<vmem>> -> memref<1x640x128xbf16, #tpu.memory_space<vmem>>
    %21 = tpu.memref_squeeze %20 : memref<1x640x128xbf16, #tpu.memory_space<vmem>> -> memref<640x128xbf16, #tpu.memory_space<vmem>>
    %22 = tpu.memref_slice %arg27[%c0_i32_22] : memref<2x!tpu.dma_semaphore, #tpu.memory_space<semaphore_mem>> -> memref<1x!tpu.dma_semaphore, #tpu.memory_space<semaphore_mem>>
    %23 = tpu.memref_squeeze %22 : memref<1x!tpu.dma_semaphore, #tpu.memory_space<semaphore_mem>> -> memref<!tpu.dma_semaphore, #tpu.memory_space<semaphore_mem>>
    tpu.enqueue_dma source(%19 : memref<640x128xbf16, #tpu.memory_space<any>>) target(%21 : memref<640x128xbf16, #tpu.memory_space<vmem>>) target_semaphore(%23 : memref<!tpu.dma_semaphore, #tpu.memory_space<semaphore_mem>>)
    %c0 = arith.constant 0 : index
    %c0_27 = arith.constant 0 : index
    %24 = vector.load %arg1[%c0, %c0_27] : memref<8x128xf32, #tpu.memory_space<vmem>>, vector<8x128xf32>
    %c0_28 = arith.constant 0 : index
    %c0_29 = arith.constant 0 : index
    %25 = vector.load %arg0[%c0_28, %c0_29] : memref<16x128xf32, #tpu.memory_space<vmem>>, vector<1x128xf32>
    %c1 = arith.constant 1 : index
    %c0_30 = arith.constant 0 : index
    %26 = vector.load %arg0[%c1, %c0_30] : memref<16x128xf32, #tpu.memory_space<vmem>>, vector<1x128xf32>
    %cst = arith.constant dense<0.000000e+00> : vector<8xf32>
    %27 = vector.multi_reduction <add>, %24, %cst [1] : vector<8x128xf32> to vector<8xf32>
    %28 = vector.shape_cast %27 : vector<8xf32> to vector<8x1xf32>
    %cst_31 = arith.constant 1.280000e+02 : f32
    %29 = vector.broadcast %cst_31 : f32 to vector<8x1xf32>
    %30 = arith.divf %28, %29 : vector<8x1xf32>
    %31 = arith.mulf %24, %24 : vector<8x128xf32>
    %cst_32 = arith.constant dense<0.000000e+00> : vector<8xf32>
    %32 = vector.multi_reduction <add>, %31, %cst_32 [1] : vector<8x128xf32> to vector<8xf32>
    %33 = vector.shape_cast %32 : vector<8xf32> to vector<8x1xf32>
    %cst_33 = arith.constant 1.280000e+02 : f32
    %34 = vector.broadcast %cst_33 : f32 to vector<8x1xf32>
    %35 = arith.divf %33, %34 : vector<8x1xf32>
    %36 = arith.mulf %30, %30 : vector<8x1xf32>
    %37 = arith.subf %35, %36 : vector<8x1xf32>
    %38 = vector.broadcast %30 : vector<8x1xf32> to vector<8x128xf32>
    %39 = arith.subf %24, %38 : vector<8x128xf32>
    %cst_34 = arith.constant 9.99999974E-6 : f32
    %40 = vector.broadcast %cst_34 : f32 to vector<8x1xf32>
    %41 = arith.addf %37, %40 : vector<8x1xf32>
    %42 = math.rsqrt %41 : vector<8x1xf32>
    %43 = vector.broadcast %42 : vector<8x1xf32> to vector<8x128xf32>
    %44 = arith.mulf %39, %43 : vector<8x128xf32>
    %45 = vector.broadcast %25 : vector<1x128xf32> to vector<8x128xf32>
    %46 = arith.mulf %44, %45 : vector<8x128xf32>
    %47 = vector.broadcast %26 : vector<1x128xf32> to vector<8x128xf32>
    %48 = arith.addf %46, %47 : vector<8x128xf32>
    %c2 = arith.constant 2 : index
    %c0_35 = arith.constant 0 : index
    %49 = vector.load %arg0[%c2, %c0_35] : memref<16x128xf32, #tpu.memory_space<vmem>>, vector<1x128xf32>
    %c3 = arith.constant 3 : index
    %c0_36 = arith.constant 0 : index
    %50 = vector.load %arg0[%c3, %c0_36] : memref<16x128xf32, #tpu.memory_space<vmem>>, vector<1x128xf32>
    %cst_37 = arith.constant dense<0.000000e+00> : vector<8xf32>
    %51 = vector.multi_reduction <add>, %48, %cst_37 [1] : vector<8x128xf32> to vector<8xf32>
    %52 = vector.shape_cast %51 : vector<8xf32> to vector<8x1xf32>
    %cst_38 = arith.constant 1.280000e+02 : f32
    %53 = vector.broadcast %cst_38 : f32 to vector<8x1xf32>
    %54 = arith.divf %52, %53 : vector<8x1xf32>
    %55 = arith.mulf %48, %48 : vector<8x128xf32>
    %cst_39 = arith.constant dense<0.000000e+00> : vector<8xf32>
    %56 = vector.multi_reduction <add>, %55, %cst_39 [1] : vector<8x128xf32> to vector<8xf32>
    %57 = vector.shape_cast %56 : vector<8xf32> to vector<8x1xf32>
    %cst_40 = arith.constant 1.280000e+02 : f32
    %58 = vector.broadcast %cst_40 : f32 to vector<8x1xf32>
    %59 = arith.divf %57, %58 : vector<8x1xf32>
    %60 = arith.mulf %54, %54 : vector<8x1xf32>
    %61 = arith.subf %59, %60 : vector<8x1xf32>
    %62 = vector.broadcast %54 : vector<8x1xf32> to vector<8x128xf32>
    %63 = arith.subf %48, %62 : vector<8x128xf32>
    %cst_41 = arith.constant 9.99999974E-6 : f32
    %64 = vector.broadcast %cst_41 : f32 to vector<8x1xf32>
    %65 = arith.addf %61, %64 : vector<8x1xf32>
    %66 = math.rsqrt %65 : vector<8x1xf32>
    %67 = vector.broadcast %66 : vector<8x1xf32> to vector<8x128xf32>
    %68 = arith.mulf %63, %67 : vector<8x128xf32>
    %69 = vector.broadcast %49 : vector<1x128xf32> to vector<8x128xf32>
    %70 = arith.mulf %68, %69 : vector<8x128xf32>
    %71 = vector.broadcast %50 : vector<1x128xf32> to vector<8x128xf32>
    %72 = arith.addf %70, %71 : vector<8x128xf32>
    %c0_42 = arith.constant 0 : index
    %c0_43 = arith.constant 0 : index
    %73 = vector.load %arg5[%c0_42, %c0_43] : memref<8x128xf32, #tpu.memory_space<vmem>>, vector<8x128xf32>
    %74 = arith.subf %72, %73 : vector<8x128xf32>
    %c8 = arith.constant 8 : index
    %c0_44 = arith.constant 0 : index
    %75 = vector.load %arg0[%c8, %c0_44] : memref<16x128xf32, #tpu.memory_space<vmem>>, vector<1x128xf32>
    %76 = vector.broadcast %75 : vector<1x128xf32> to vector<8x128xf32>
    %77 = arith.mulf %76, %74 : vector<8x128xf32>
    %78 = arith.addf %73, %77 : vector<8x128xf32>
    %79 = arith.truncf %78 : vector<8x128xf32> to vector<8x128xbf16>
    %c9 = arith.constant 9 : index
    %c0_45 = arith.constant 0 : index
    %80 = vector.load %arg0[%c9, %c0_45] : memref<16x128xf32, #tpu.memory_space<vmem>>, vector<1x128xf32>
    %81 = vector.broadcast %80 : vector<1x128xf32> to vector<8x128xf32>
    %82 = arith.mulf %81, %74 : vector<8x128xf32>
    %83 = arith.addf %73, %82 : vector<8x128xf32>
    %84 = arith.truncf %83 : vector<8x128xf32> to vector<8x128xbf16>
    %c10 = arith.constant 10 : index
    %c0_46 = arith.constant 0 : index
    %85 = vector.load %arg0[%c10, %c0_46] : memref<16x128xf32, #tpu.memory_space<vmem>>, vector<1x128xf32>
    %86 = vector.broadcast %85 : vector<1x128xf32> to vector<8x128xf32>
    %87 = arith.mulf %86, %74 : vector<8x128xf32>
    %88 = arith.addf %73, %87 : vector<8x128xf32>
    %89 = arith.truncf %88 : vector<8x128xf32> to vector<8x128xbf16>
    %c0_i32_47 = arith.constant 0 : i32
    %c0_i32_48 = arith.constant 0 : i32
    %c0_i32_49 = arith.constant 0 : i32
    %c0_i32_50 = arith.constant 0 : i32
    %c0_i32_51 = arith.constant 0 : i32
    %90 = tpu.memref_slice %arg7[%c0_i32_47, %c0_i32_50, %c0_i32_51] : memref<1x128x384xbf16, #tpu.memory_space<any>> -> memref<1x128x384xbf16, #tpu.memory_space<any>>
    %91 = tpu.memref_squeeze %90 : memref<1x128x384xbf16, #tpu.memory_space<any>> -> memref<128x384xbf16, #tpu.memory_space<any>>
    %c0_i32_52 = arith.constant 0 : i32
    %c0_i32_53 = arith.constant 0 : i32
    %92 = tpu.memref_slice %arg17[%c0_i32_48, %c0_i32_52, %c0_i32_53] : memref<2x128x384xbf16, #tpu.memory_space<vmem>> -> memref<1x128x384xbf16, #tpu.memory_space<vmem>>
    %93 = tpu.memref_squeeze %92 : memref<1x128x384xbf16, #tpu.memory_space<vmem>> -> memref<128x384xbf16, #tpu.memory_space<vmem>>
    %94 = tpu.memref_slice %arg24[%c0_i32_49] : memref<2x!tpu.dma_semaphore, #tpu.memory_space<semaphore_mem>> -> memref<1x!tpu.dma_semaphore, #tpu.memory_space<semaphore_mem>>
    %95 = tpu.memref_squeeze %94 : memref<1x!tpu.dma_semaphore, #tpu.memory_space<semaphore_mem>> -> memref<!tpu.dma_semaphore, #tpu.memory_space<semaphore_mem>>
    tpu.wait_dma2 semaphore(%95 : memref<!tpu.dma_semaphore, #tpu.memory_space<semaphore_mem>>) src(%91 : memref<128x384xbf16, #tpu.memory_space<any>>) dst(%93 : memref<128x384xbf16, #tpu.memory_space<vmem>>)
    %c0_54 = arith.constant 0 : index
    %c0_55 = arith.constant 0 : index
    %c0_56 = arith.constant 0 : index
    %96 = vector.load %arg17[%c0_54, %c0_55, %c0_56] : memref<2x128x384xbf16, #tpu.memory_space<vmem>>, vector<1x128x128xbf16>
    %97 = vector.shape_cast %96 : vector<1x128x128xbf16> to vector<128x128xbf16>
    %c0_57 = arith.constant 0 : index
    %c0_58 = arith.constant 0 : index
    %c128 = arith.constant 128 : index
    %98 = vector.load %arg17[%c0_57, %c0_58, %c128] : memref<2x128x384xbf16, #tpu.memory_space<vmem>>, vector<1x128x128xbf16>
    %99 = vector.shape_cast %98 : vector<1x128x128xbf16> to vector<128x128xbf16>
    %c0_59 = arith.constant 0 : index
    %c0_60 = arith.constant 0 : index
    %c256 = arith.constant 256 : index
    %100 = vector.load %arg17[%c0_59, %c0_60, %c256] : memref<2x128x384xbf16, #tpu.memory_space<vmem>>, vector<1x128x128xbf16>
    %101 = vector.shape_cast %100 : vector<1x128x128xbf16> to vector<128x128xbf16>
    %cst_61 = arith.constant dense<0.000000e+00> : vector<8x128xf32>
    %102 = tpu.matmul %79, %97, %cst_61 {dimension_numbers = #tpu.dot_dimension_numbers<[1], [0], [0], [1], [0, 0, 1, 1], [], []>} : vector<8x128xbf16>, vector<128x128xbf16>, vector<8x128xf32> -> vector<8x128xf32>
    %cst_62 = arith.constant dense<0.000000e+00> : vector<8x128xf32>
    %103 = tpu.matmul %84, %99, %cst_62 {dimension_numbers = #tpu.dot_dimension_numbers<[1], [0], [0], [1], [0, 0, 1, 1], [], []>} : vector<8x128xbf16>, vector<128x128xbf16>, vector<8x128xf32> -> vector<8x128xf32>
    %cst_63 = arith.constant dense<0.000000e+00> : vector<8x128xf32>
    %104 = tpu.matmul %89, %101, %cst_63 {dimension_numbers = #tpu.dot_dimension_numbers<[1], [0], [0], [1], [0, 0, 1, 1], [], []>} : vector<8x128xbf16>, vector<128x128xbf16>, vector<8x128xf32> -> vector<8x128xf32>
    %105 = arith.negf %104 : vector<8x128xf32>
    %106 = math.exp %105 : vector<8x128xf32>
    %cst_64 = arith.constant 1.000000e+00 : f32
    %107 = vector.broadcast %cst_64 : f32 to vector<8x128xf32>
    %108 = arith.addf %107, %106 : vector<8x128xf32>
    %109 = arith.divf %107, %108 : vector<8x128xf32>
    %c0_65 = arith.constant 0 : index
    %c0_66 = arith.constant 0 : index
    %110 = vector.load %arg2[%c0_65, %c0_66] : memref<8x128xf32, #tpu.memory_space<vmem>>, vector<8x128xf32>
    %c0_67 = arith.constant 0 : index
    %c0_68 = arith.constant 0 : index
    %111 = vector.load %arg3[%c0_67, %c0_68] : memref<8x128xf32, #tpu.memory_space<vmem>>, vector<8x128xf32>
    %c0_69 = arith.constant 0 : index
    %c0_70 = arith.constant 0 : index
    %112 = vector.load %arg4[%c0_69, %c0_70] : memref<8x128xf32, #tpu.memory_space<vmem>>, vector<8x128xf32>
    %c7 = arith.constant 7 : index
    %c0_71 = arith.constant 0 : index
    %113 = vector.load %arg0[%c7, %c0_71] : memref<16x128xf32, #tpu.memory_space<vmem>>, vector<1x128xf32>
    %c6 = arith.constant 6 : index
    %c0_72 = arith.constant 0 : index
    %114 = vector.load %arg0[%c6, %c0_72] : memref<16x128xf32, #tpu.memory_space<vmem>>, vector<1x128xf32>
    %115 = vector.broadcast %113 : vector<1x128xf32> to vector<8x128xf32>
    %116 = arith.addf %115, %102 : vector<8x128xf32>
    %117 = arith.maximumf %112, %116 : vector<8x128xf32>
    %118 = arith.subf %112, %117 : vector<8x128xf32>
    %119 = math.exp %118 : vector<8x128xf32>
    %120 = arith.subf %116, %117 : vector<8x128xf32>
    %121 = math.exp %120 : vector<8x128xf32>
    %122 = arith.mulf %119, %110 : vector<8x128xf32>
    %123 = arith.mulf %121, %103 : vector<8x128xf32>
    %124 = arith.addf %122, %123 : vector<8x128xf32>
    %125 = arith.mulf %119, %111 : vector<8x128xf32>
    %126 = arith.addf %125, %121 : vector<8x128xf32>
    %127 = vector.broadcast %114 : vector<1x128xf32> to vector<8x128xf32>
    %128 = arith.addf %112, %127 : vector<8x128xf32>
    %129 = arith.maximumf %128, %102 : vector<8x128xf32>
    %130 = arith.subf %128, %129 : vector<8x128xf32>
    %131 = math.exp %130 : vector<8x128xf32>
    %132 = arith.subf %102, %129 : vector<8x128xf32>
    %133 = math.exp %132 : vector<8x128xf32>
    %134 = arith.mulf %131, %110 : vector<8x128xf32>
    %135 = arith.mulf %133, %103 : vector<8x128xf32>
    %136 = arith.addf %134, %135 : vector<8x128xf32>
    %c0_73 = arith.constant 0 : index
    %c0_74 = arith.constant 0 : index
    %137 = vector.load %arg12[%c0_73, %c0_74] : memref<8x128xf32, #tpu.memory_space<vmem>>, vector<8x128xf32>
    tpu.vector_store %arg12[%c0_73, %c0_74], %136 {strides = array<i32>} : memref<8x128xf32, #tpu.memory_space<vmem>>, vector<8x128xf32>,
    %138 = arith.mulf %131, %111 : vector<8x128xf32>
    %139 = arith.addf %138, %133 : vector<8x128xf32>
    %c0_75 = arith.constant 0 : index
    %c0_76 = arith.constant 0 : index
    %140 = vector.load %arg13[%c0_75, %c0_76] : memref<8x128xf32, #tpu.memory_space<vmem>>, vector<8x128xf32>
    tpu.vector_store %arg13[%c0_75, %c0_76], %139 {strides = array<i32>} : memref<8x128xf32, #tpu.memory_space<vmem>>, vector<8x128xf32>,
    %c0_77 = arith.constant 0 : index
    %c0_78 = arith.constant 0 : index
    %141 = vector.load %arg14[%c0_77, %c0_78] : memref<8x128xf32, #tpu.memory_space<vmem>>, vector<8x128xf32>
    tpu.vector_store %arg14[%c0_77, %c0_78], %129 {strides = array<i32>} : memref<8x128xf32, #tpu.memory_space<vmem>>, vector<8x128xf32>,
    %142 = arith.mulf %109, %124 : vector<8x128xf32>
    %143 = tpu.reciprocal %126 {approx = true} : vector<8x128xf32> -> vector<8x128xf32>
    %144 = arith.mulf %142, %143 : vector<8x128xf32>
    %c0_79 = arith.constant 0 : index
    %c0_80 = arith.constant 0 : index
    %145 = vector.load %arg21[%c0_79, %c0_80] : memref<8x128xf32, #tpu.memory_space<vmem>>, vector<8x128xf32>
    tpu.vector_store %arg21[%c0_79, %c0_80], %144 {strides = array<i32>} : memref<8x128xf32, #tpu.memory_space<vmem>>, vector<8x128xf32>,
    %c0_81 = arith.constant 0 : index
    %c0_82 = arith.constant 0 : index
    %146 = vector.load %arg21[%c0_81, %c0_82] : memref<8x128xf32, #tpu.memory_space<vmem>>, vector<8x128xf32>
    %147 = arith.truncf %146 : vector<8x128xf32> to vector<8x128xbf16>
    %c0_i32_83 = arith.constant 0 : i32
    %c0_i32_84 = arith.constant 0 : i32
    %c0_i32_85 = arith.constant 0 : i32
    %c0_i32_86 = arith.constant 0 : i32
    %c0_i32_87 = arith.constant 0 : i32
    %148 = tpu.memref_slice %arg8[%c0_i32_83, %c0_i32_86, %c0_i32_87] : memref<1x128x128xbf16, #tpu.memory_space<any>> -> memref<1x128x128xbf16, #tpu.memory_space<any>>
    %149 = tpu.memref_squeeze %148 : memref<1x128x128xbf16, #tpu.memory_space<any>> -> memref<128x128xbf16, #tpu.memory_space<any>>
    %c0_i32_88 = arith.constant 0 : i32
    %c0_i32_89 = arith.constant 0 : i32
    %150 = tpu.memref_slice %arg18[%c0_i32_84, %c0_i32_88, %c0_i32_89] : memref<2x128x128xbf16, #tpu.memory_space<vmem>> -> memref<1x128x128xbf16, #tpu.memory_space<vmem>>
    %151 = tpu.memref_squeeze %150 : memref<1x128x128xbf16, #tpu.memory_space<vmem>> -> memref<128x128xbf16, #tpu.memory_space<vmem>>
    %152 = tpu.memref_slice %arg25[%c0_i32_85] : memref<2x!tpu.dma_semaphore, #tpu.memory_space<semaphore_mem>> -> memref<1x!tpu.dma_semaphore, #tpu.memory_space<semaphore_mem>>
    %153 = tpu.memref_squeeze %152 : memref<1x!tpu.dma_semaphore, #tpu.memory_space<semaphore_mem>> -> memref<!tpu.dma_semaphore, #tpu.memory_space<semaphore_mem>>
    tpu.wait_dma2 semaphore(%153 : memref<!tpu.dma_semaphore, #tpu.memory_space<semaphore_mem>>) src(%149 : memref<128x128xbf16, #tpu.memory_space<any>>) dst(%151 : memref<128x128xbf16, #tpu.memory_space<vmem>>)
    %c0_90 = arith.constant 0 : index
    %c0_91 = arith.constant 0 : index
    %c0_92 = arith.constant 0 : index
    %154 = vector.load %arg18[%c0_90, %c0_91, %c0_92] : memref<2x128x128xbf16, #tpu.memory_space<vmem>>, vector<1x128x128xbf16>
    %155 = vector.shape_cast %154 : vector<1x128x128xbf16> to vector<128x128xbf16>
    %cst_93 = arith.constant dense<0.000000e+00> : vector<8x128xf32>
    %156 = tpu.matmul %147, %155, %cst_93 {dimension_numbers = #tpu.dot_dimension_numbers<[1], [0], [0], [1], [0, 0, 1, 1], [], []>} : vector<8x128xbf16>, vector<128x128xbf16>, vector<8x128xf32> -> vector<8x128xf32>
    %157 = arith.addf %48, %156 : vector<8x128xf32>
    %c0_94 = arith.constant 0 : index
    %c0_95 = arith.constant 0 : index
    %158 = vector.load %arg22[%c0_94, %c0_95] : memref<8x128xf32, #tpu.memory_space<vmem>>, vector<8x128xf32>
    tpu.vector_store %arg22[%c0_94, %c0_95], %157 {strides = array<i32>} : memref<8x128xf32, #tpu.memory_space<vmem>>, vector<8x128xf32>,
    %c0_96 = arith.constant 0 : index
    %c0_97 = arith.constant 0 : index
    %159 = vector.load %arg22[%c0_96, %c0_97] : memref<8x128xf32, #tpu.memory_space<vmem>>, vector<8x128xf32>
    %c4 = arith.constant 4 : index
    %c0_98 = arith.constant 0 : index
    %160 = vector.load %arg0[%c4, %c0_98] : memref<16x128xf32, #tpu.memory_space<vmem>>, vector<1x128xf32>
    %c5 = arith.constant 5 : index
    %c0_99 = arith.constant 0 : index
    %161 = vector.load %arg0[%c5, %c0_99] : memref<16x128xf32, #tpu.memory_space<vmem>>, vector<1x128xf32>
    %cst_100 = arith.constant dense<0.000000e+00> : vector<8xf32>
    %162 = vector.multi_reduction <add>, %159, %cst_100 [1] : vector<8x128xf32> to vector<8xf32>
    %163 = vector.shape_cast %162 : vector<8xf32> to vector<8x1xf32>
    %cst_101 = arith.constant 1.280000e+02 : f32
    %164 = vector.broadcast %cst_101 : f32 to vector<8x1xf32>
    %165 = arith.divf %163, %164 : vector<8x1xf32>
    %166 = arith.mulf %159, %159 : vector<8x128xf32>
    %cst_102 = arith.constant dense<0.000000e+00> : vector<8xf32>
    %167 = vector.multi_reduction <add>, %166, %cst_102 [1] : vector<8x128xf32> to vector<8xf32>
    %168 = vector.shape_cast %167 : vector<8xf32> to vector<8x1xf32>
    %cst_103 = arith.constant 1.280000e+02 : f32
    %169 = vector.broadcast %cst_103 : f32 to vector<8x1xf32>
    %170 = arith.divf %168, %169 : vector<8x1xf32>
    %171 = arith.mulf %165, %165 : vector<8x1xf32>
    %172 = arith.subf %170, %171 : vector<8x1xf32>
    %173 = vector.broadcast %165 : vector<8x1xf32> to vector<8x128xf32>
    %174 = arith.subf %159, %173 : vector<8x128xf32>
    %cst_104 = arith.constant 9.99999974E-6 : f32
    %175 = vector.broadcast %cst_104 : f32 to vector<8x1xf32>
    %176 = arith.addf %172, %175 : vector<8x1xf32>
    %177 = math.rsqrt %176 : vector<8x1xf32>
    %178 = vector.broadcast %177 : vector<8x1xf32> to vector<8x128xf32>
    %179 = arith.mulf %174, %178 : vector<8x128xf32>
    %180 = vector.broadcast %160 : vector<1x128xf32> to vector<8x128xf32>
    %181 = arith.mulf %179, %180 : vector<8x128xf32>
    %182 = vector.broadcast %161 : vector<1x128xf32> to vector<8x128xf32>
    %183 = arith.addf %181, %182 : vector<8x128xf32>
    %c0_105 = arith.constant 0 : index
    %c0_106 = arith.constant 0 : index
    %184 = vector.load %arg6[%c0_105, %c0_106] : memref<8x128xf32, #tpu.memory_space<vmem>>, vector<8x128xf32>
    %185 = arith.subf %183, %184 : vector<8x128xf32>
    %c11 = arith.constant 11 : index
    %c0_107 = arith.constant 0 : index
    %186 = vector.load %arg0[%c11, %c0_107] : memref<16x128xf32, #tpu.memory_space<vmem>>, vector<1x128xf32>
    %187 = vector.broadcast %186 : vector<1x128xf32> to vector<8x128xf32>
    %188 = arith.mulf %187, %185 : vector<8x128xf32>
    %189 = arith.addf %184, %188 : vector<8x128xf32>
    %190 = arith.truncf %189 : vector<8x128xf32> to vector<8x128xbf16>
    %c12 = arith.constant 12 : index
    %c0_108 = arith.constant 0 : index
    %191 = vector.load %arg0[%c12, %c0_108] : memref<16x128xf32, #tpu.memory_space<vmem>>, vector<1x128xf32>
    %192 = vector.broadcast %191 : vector<1x128xf32> to vector<8x128xf32>
    %193 = arith.mulf %192, %185 : vector<8x128xf32>
    %194 = arith.addf %184, %193 : vector<8x128xf32>
    %195 = arith.truncf %194 : vector<8x128xf32> to vector<8x128xbf16>
    %c1_i32 = arith.constant 1 : i32
    %c1_i32_109 = arith.constant 1 : i32
    %c1_i32_110 = arith.constant 1 : i32
    %c0_i32_111 = arith.constant 0 : i32
    %c0_i32_112 = arith.constant 0 : i32
    %196 = tpu.memref_slice %arg9[%c1_i32, %c0_i32_111, %c0_i32_112] : memref<4x128x128xbf16, #tpu.memory_space<any>> -> memref<1x128x128xbf16, #tpu.memory_space<any>>
    %197 = tpu.memref_squeeze %196 : memref<1x128x128xbf16, #tpu.memory_space<any>> -> memref<128x128xbf16, #tpu.memory_space<any>>
    %c0_i32_113 = arith.constant 0 : i32
    %c0_i32_114 = arith.constant 0 : i32
    %198 = tpu.memref_slice %arg19[%c1_i32_109, %c0_i32_113, %c0_i32_114] : memref<2x128x128xbf16, #tpu.memory_space<vmem>> -> memref<1x128x128xbf16, #tpu.memory_space<vmem>>
    %199 = tpu.memref_squeeze %198 : memref<1x128x128xbf16, #tpu.memory_space<vmem>> -> memref<128x128xbf16, #tpu.memory_space<vmem>>
    %200 = tpu.memref_slice %arg26[%c1_i32_110] : memref<2x!tpu.dma_semaphore, #tpu.memory_space<semaphore_mem>> -> memref<1x!tpu.dma_semaphore, #tpu.memory_space<semaphore_mem>>
    %201 = tpu.memref_squeeze %200 : memref<1x!tpu.dma_semaphore, #tpu.memory_space<semaphore_mem>> -> memref<!tpu.dma_semaphore, #tpu.memory_space<semaphore_mem>>
    tpu.enqueue_dma source(%197 : memref<128x128xbf16, #tpu.memory_space<any>>) target(%199 : memref<128x128xbf16, #tpu.memory_space<vmem>>) target_semaphore(%201 : memref<!tpu.dma_semaphore, #tpu.memory_space<semaphore_mem>>)
    %c0_i32_115 = arith.constant 0 : i32
    %c0_i32_116 = arith.constant 0 : i32
    %c0_i32_117 = arith.constant 0 : i32
    %c0_i32_118 = arith.constant 0 : i32
    %c0_i32_119 = arith.constant 0 : i32
    %202 = tpu.memref_slice %arg9[%c0_i32_115, %c0_i32_118, %c0_i32_119] : memref<4x128x128xbf16, #tpu.memory_space<any>> -> memref<1x128x128xbf16, #tpu.memory_space<any>>
    %203 = tpu.memref_squeeze %202 : memref<1x128x128xbf16, #tpu.memory_space<any>> -> memref<128x128xbf16, #tpu.memory_space<any>>
    %c0_i32_120 = arith.constant 0 : i32
    %c0_i32_121 = arith.constant 0 : i32
    %204 = tpu.memref_slice %arg19[%c0_i32_116, %c0_i32_120, %c0_i32_121] : memref<2x128x128xbf16, #tpu.memory_space<vmem>> -> memref<1x128x128xbf16, #tpu.memory_space<vmem>>
    %205 = tpu.memref_squeeze %204 : memref<1x128x128xbf16, #tpu.memory_space<vmem>> -> memref<128x128xbf16, #tpu.memory_space<vmem>>
    %206 = tpu.memref_slice %arg26[%c0_i32_117] : memref<2x!tpu.dma_semaphore, #tpu.memory_space<semaphore_mem>> -> memref<1x!tpu.dma_semaphore, #tpu.memory_space<semaphore_mem>>
    %207 = tpu.memref_squeeze %206 : memref<1x!tpu.dma_semaphore, #tpu.memory_space<semaphore_mem>> -> memref<!tpu.dma_semaphore, #tpu.memory_space<semaphore_mem>>
    tpu.wait_dma2 semaphore(%207 : memref<!tpu.dma_semaphore, #tpu.memory_space<semaphore_mem>>) src(%203 : memref<128x128xbf16, #tpu.memory_space<any>>) dst(%205 : memref<128x128xbf16, #tpu.memory_space<vmem>>)
    %c0_122 = arith.constant 0 : index
    %c0_123 = arith.constant 0 : index
    %c0_124 = arith.constant 0 : index
    %208 = vector.load %arg19[%c0_122, %c0_123, %c0_124] : memref<2x128x128xbf16, #tpu.memory_space<vmem>>, vector<1x128x128xbf16>
    %209 = vector.shape_cast %208 : vector<1x128x128xbf16> to vector<128x128xbf16>
    %cst_125 = arith.constant dense<0.000000e+00> : vector<8x128xf32>
    %210 = tpu.matmul %190, %209, %cst_125 {dimension_numbers = #tpu.dot_dimension_numbers<[1], [0], [0], [1], [0, 0, 1, 1], [], []>} : vector<8x128xbf16>, vector<128x128xbf16>, vector<8x128xf32> -> vector<8x128xf32>
    %cst_126 = arith.constant 0.000000e+00 : f32
    %211 = vector.broadcast %cst_126 : f32 to vector<8x128xf32>
    %212 = arith.maximumf %210, %211 : vector<8x128xf32>
    %213 = arith.mulf %212, %212 : vector<8x128xf32>
    %c0_127 = arith.constant 0 : index
    %c0_128 = arith.constant 0 : index
    %214 = vector.load %arg23[%c0_127, %c0_128] : memref<8x512xf32, #tpu.memory_space<vmem>>, vector<8x128xf32>
    tpu.vector_store %arg23[%c0_127, %c0_128], %213 {strides = array<i32>} : memref<8x512xf32, #tpu.memory_space<vmem>>, vector<8x128xf32>,
    %c2_i32 = arith.constant 2 : i32
    %c0_i32_129 = arith.constant 0 : i32
    %c0_i32_130 = arith.constant 0 : i32
    %c0_i32_131 = arith.constant 0 : i32
    %c0_i32_132 = arith.constant 0 : i32
    %215 = tpu.memref_slice %arg9[%c2_i32, %c0_i32_131, %c0_i32_132] : memref<4x128x128xbf16, #tpu.memory_space<any>> -> memref<1x128x128xbf16, #tpu.memory_space<any>>
    %216 = tpu.memref_squeeze %215 : memref<1x128x128xbf16, #tpu.memory_space<any>> -> memref<128x128xbf16, #tpu.memory_space<any>>
    %c0_i32_133 = arith.constant 0 : i32
    %c0_i32_134 = arith.constant 0 : i32
    %217 = tpu.memref_slice %arg19[%c0_i32_129, %c0_i32_133, %c0_i32_134] : memref<2x128x128xbf16, #tpu.memory_space<vmem>> -> memref<1x128x128xbf16, #tpu.memory_space<vmem>>
    %218 = tpu.memref_squeeze %217 : memref<1x128x128xbf16, #tpu.memory_space<vmem>> -> memref<128x128xbf16, #tpu.memory_space<vmem>>
    %219 = tpu.memref_slice %arg26[%c0_i32_130] : memref<2x!tpu.dma_semaphore, #tpu.memory_space<semaphore_mem>> -> memref<1x!tpu.dma_semaphore, #tpu.memory_space<semaphore_mem>>
    %220 = tpu.memref_squeeze %219 : memref<1x!tpu.dma_semaphore, #tpu.memory_space<semaphore_mem>> -> memref<!tpu.dma_semaphore, #tpu.memory_space<semaphore_mem>>
    tpu.enqueue_dma source(%216 : memref<128x128xbf16, #tpu.memory_space<any>>) target(%218 : memref<128x128xbf16, #tpu.memory_space<vmem>>) target_semaphore(%220 : memref<!tpu.dma_semaphore, #tpu.memory_space<semaphore_mem>>)
    %c1_i32_135 = arith.constant 1 : i32
    %c1_i32_136 = arith.constant 1 : i32
    %c1_i32_137 = arith.constant 1 : i32
    %c0_i32_138 = arith.constant 0 : i32
    %c0_i32_139 = arith.constant 0 : i32
    %221 = tpu.memref_slice %arg9[%c1_i32_135, %c0_i32_138, %c0_i32_139] : memref<4x128x128xbf16, #tpu.memory_space<any>> -> memref<1x128x128xbf16, #tpu.memory_space<any>>
    %222 = tpu.memref_squeeze %221 : memref<1x128x128xbf16, #tpu.memory_space<any>> -> memref<128x128xbf16, #tpu.memory_space<any>>
    %c0_i32_140 = arith.constant 0 : i32
    %c0_i32_141 = arith.constant 0 : i32
    %223 = tpu.memref_slice %arg19[%c1_i32_136, %c0_i32_140, %c0_i32_141] : memref<2x128x128xbf16, #tpu.memory_space<vmem>> -> memref<1x128x128xbf16, #tpu.memory_space<vmem>>
    %224 = tpu.memref_squeeze %223 : memref<1x128x128xbf16, #tpu.memory_space<vmem>> -> memref<128x128xbf16, #tpu.memory_space<vmem>>
    %225 = tpu.memref_slice %arg26[%c1_i32_137] : memref<2x!tpu.dma_semaphore, #tpu.memory_space<semaphore_mem>> -> memref<1x!tpu.dma_semaphore, #tpu.memory_space<semaphore_mem>>
    %226 = tpu.memref_squeeze %225 : memref<1x!tpu.dma_semaphore, #tpu.memory_space<semaphore_mem>> -> memref<!tpu.dma_semaphore, #tpu.memory_space<semaphore_mem>>
    tpu.wait_dma2 semaphore(%226 : memref<!tpu.dma_semaphore, #tpu.memory_space<semaphore_mem>>) src(%222 : memref<128x128xbf16, #tpu.memory_space<any>>) dst(%224 : memref<128x128xbf16, #tpu.memory_space<vmem>>)
    %c1_142 = arith.constant 1 : index
    %c0_143 = arith.constant 0 : index
    %c0_144 = arith.constant 0 : index
    %227 = vector.load %arg19[%c1_142, %c0_143, %c0_144] : memref<2x128x128xbf16, #tpu.memory_space<vmem>>, vector<1x128x128xbf16>
    %228 = vector.shape_cast %227 : vector<1x128x128xbf16> to vector<128x128xbf16>
    %cst_145 = arith.constant dense<0.000000e+00> : vector<8x128xf32>
    %229 = tpu.matmul %190, %228, %cst_145 {dimension_numbers = #tpu.dot_dimension_numbers<[1], [0], [0], [1], [0, 0, 1, 1], [], []>} : vector<8x128xbf16>, vector<128x128xbf16>, vector<8x128xf32> -> vector<8x128xf32>
    %cst_146 = arith.constant 0.000000e+00 : f32
    %230 = vector.broadcast %cst_146 : f32 to vector<8x128xf32>
    %231 = arith.maximumf %229, %230 : vector<8x128xf32>
    %232 = arith.mulf %231, %231 : vector<8x128xf32>
    %c0_147 = arith.constant 0 : index
    %c128_148 = arith.constant 128 : index
    %233 = vector.load %arg23[%c0_147, %c128_148] : memref<8x512xf32, #tpu.memory_space<vmem>>, vector<8x128xf32>
    tpu.vector_store %arg23[%c0_147, %c128_148], %232 {strides = array<i32>} : memref<8x512xf32, #tpu.memory_space<vmem>>, vector<8x128xf32>,
    %c3_i32 = arith.constant 3 : i32
    %c1_i32_149 = arith.constant 1 : i32
    %c1_i32_150 = arith.constant 1 : i32
    %c0_i32_151 = arith.constant 0 : i32
    %c0_i32_152 = arith.constant 0 : i32
    %234 = tpu.memref_slice %arg9[%c3_i32, %c0_i32_151, %c0_i32_152] : memref<4x128x128xbf16, #tpu.memory_space<any>> -> memref<1x128x128xbf16, #tpu.memory_space<any>>
    %235 = tpu.memref_squeeze %234 : memref<1x128x128xbf16, #tpu.memory_space<any>> -> memref<128x128xbf16, #tpu.memory_space<any>>
    %c0_i32_153 = arith.constant 0 : i32
    %c0_i32_154 = arith.constant 0 : i32
    %236 = tpu.memref_slice %arg19[%c1_i32_149, %c0_i32_153, %c0_i32_154] : memref<2x128x128xbf16, #tpu.memory_space<vmem>> -> memref<1x128x128xbf16, #tpu.memory_space<vmem>>
    %237 = tpu.memref_squeeze %236 : memref<1x128x128xbf16, #tpu.memory_space<vmem>> -> memref<128x128xbf16, #tpu.memory_space<vmem>>
    %238 = tpu.memref_slice %arg26[%c1_i32_150] : memref<2x!tpu.dma_semaphore, #tpu.memory_space<semaphore_mem>> -> memref<1x!tpu.dma_semaphore, #tpu.memory_space<semaphore_mem>>
    %239 = tpu.memref_squeeze %238 : memref<1x!tpu.dma_semaphore, #tpu.memory_space<semaphore_mem>> -> memref<!tpu.dma_semaphore, #tpu.memory_space<semaphore_mem>>
    tpu.enqueue_dma source(%235 : memref<128x128xbf16, #tpu.memory_space<any>>) target(%237 : memref<128x128xbf16, #tpu.memory_space<vmem>>) target_semaphore(%239 : memref<!tpu.dma_semaphore, #tpu.memory_space<semaphore_mem>>)
    %c2_i32_155 = arith.constant 2 : i32
    %c0_i32_156 = arith.constant 0 : i32
    %c0_i32_157 = arith.constant 0 : i32
    %c0_i32_158 = arith.constant 0 : i32
    %c0_i32_159 = arith.constant 0 : i32
    %240 = tpu.memref_slice %arg9[%c2_i32_155, %c0_i32_158, %c0_i32_159] : memref<4x128x128xbf16, #tpu.memory_space<any>> -> memref<1x128x128xbf16, #tpu.memory_space<any>>
    %241 = tpu.memref_squeeze %240 : memref<1x128x128xbf16, #tpu.memory_space<any>> -> memref<128x128xbf16, #tpu.memory_space<any>>
    %c0_i32_160 = arith.constant 0 : i32
    %c0_i32_161 = arith.constant 0 : i32
    %242 = tpu.memref_slice %arg19[%c0_i32_156, %c0_i32_160, %c0_i32_161] : memref<2x128x128xbf16, #tpu.memory_space<vmem>> -> memref<1x128x128xbf16, #tpu.memory_space<vmem>>
    %243 = tpu.memref_squeeze %242 : memref<1x128x128xbf16, #tpu.memory_space<vmem>> -> memref<128x128xbf16, #tpu.memory_space<vmem>>
    %244 = tpu.memref_slice %arg26[%c0_i32_157] : memref<2x!tpu.dma_semaphore, #tpu.memory_space<semaphore_mem>> -> memref<1x!tpu.dma_semaphore, #tpu.memory_space<semaphore_mem>>
    %245 = tpu.memref_squeeze %244 : memref<1x!tpu.dma_semaphore, #tpu.memory_space<semaphore_mem>> -> memref<!tpu.dma_semaphore, #tpu.memory_space<semaphore_mem>>
    tpu.wait_dma2 semaphore(%245 : memref<!tpu.dma_semaphore, #tpu.memory_space<semaphore_mem>>) src(%241 : memref<128x128xbf16, #tpu.memory_space<any>>) dst(%243 : memref<128x128xbf16, #tpu.memory_space<vmem>>)
    %c0_162 = arith.constant 0 : index
    %c0_163 = arith.constant 0 : index
    %c0_164 = arith.constant 0 : index
    %246 = vector.load %arg19[%c0_162, %c0_163, %c0_164] : memref<2x128x128xbf16, #tpu.memory_space<vmem>>, vector<1x128x128xbf16>
    %247 = vector.shape_cast %246 : vector<1x128x128xbf16> to vector<128x128xbf16>
    %cst_165 = arith.constant dense<0.000000e+00> : vector<8x128xf32>
    %248 = tpu.matmul %190, %247, %cst_165 {dimension_numbers = #tpu.dot_dimension_numbers<[1], [0], [0], [1], [0, 0, 1, 1], [], []>} : vector<8x128xbf16>, vector<128x128xbf16>, vector<8x128xf32> -> vector<8x128xf32>
    %cst_166 = arith.constant 0.000000e+00 : f32
    %249 = vector.broadcast %cst_166 : f32 to vector<8x128xf32>
    %250 = arith.maximumf %248, %249 : vector<8x128xf32>
    %251 = arith.mulf %250, %250 : vector<8x128xf32>
    %c0_167 = arith.constant 0 : index
    %c256_168 = arith.constant 256 : index
    %252 = vector.load %arg23[%c0_167, %c256_168] : memref<8x512xf32, #tpu.memory_space<vmem>>, vector<8x128xf32>
    tpu.vector_store %arg23[%c0_167, %c256_168], %251 {strides = array<i32>} : memref<8x512xf32, #tpu.memory_space<vmem>>, vector<8x128xf32>,
    %c3_i32_169 = arith.constant 3 : i32
    %c1_i32_170 = arith.constant 1 : i32
    %c1_i32_171 = arith.constant 1 : i32
    %c0_i32_172 = arith.constant 0 : i32
    %c0_i32_173 = arith.constant 0 : i32
    %253 = tpu.memref_slice %arg9[%c3_i32_169, %c0_i32_172, %c0_i32_173] : memref<4x128x128xbf16, #tpu.memory_space<any>> -> memref<1x128x128xbf16, #tpu.memory_space<any>>
    %254 = tpu.memref_squeeze %253 : memref<1x128x128xbf16, #tpu.memory_space<any>> -> memref<128x128xbf16, #tpu.memory_space<any>>
    %c0_i32_174 = arith.constant 0 : i32
    %c0_i32_175 = arith.constant 0 : i32
    %255 = tpu.memref_slice %arg19[%c1_i32_170, %c0_i32_174, %c0_i32_175] : memref<2x128x128xbf16, #tpu.memory_space<vmem>> -> memref<1x128x128xbf16, #tpu.memory_space<vmem>>
    %256 = tpu.memref_squeeze %255 : memref<1x128x128xbf16, #tpu.memory_space<vmem>> -> memref<128x128xbf16, #tpu.memory_space<vmem>>
    %257 = tpu.memref_slice %arg26[%c1_i32_171] : memref<2x!tpu.dma_semaphore, #tpu.memory_space<semaphore_mem>> -> memref<1x!tpu.dma_semaphore, #tpu.memory_space<semaphore_mem>>
    %258 = tpu.memref_squeeze %257 : memref<1x!tpu.dma_semaphore, #tpu.memory_space<semaphore_mem>> -> memref<!tpu.dma_semaphore, #tpu.memory_space<semaphore_mem>>
    tpu.wait_dma2 semaphore(%258 : memref<!tpu.dma_semaphore, #tpu.memory_space<semaphore_mem>>) src(%254 : memref<128x128xbf16, #tpu.memory_space<any>>) dst(%256 : memref<128x128xbf16, #tpu.memory_space<vmem>>)
    %c1_176 = arith.constant 1 : index
    %c0_177 = arith.constant 0 : index
    %c0_178 = arith.constant 0 : index
    %259 = vector.load %arg19[%c1_176, %c0_177, %c0_178] : memref<2x128x128xbf16, #tpu.memory_space<vmem>>, vector<1x128x128xbf16>
    %260 = vector.shape_cast %259 : vector<1x128x128xbf16> to vector<128x128xbf16>
    %cst_179 = arith.constant dense<0.000000e+00> : vector<8x128xf32>
    %261 = tpu.matmul %190, %260, %cst_179 {dimension_numbers = #tpu.dot_dimension_numbers<[1], [0], [0], [1], [0, 0, 1, 1], [], []>} : vector<8x128xbf16>, vector<128x128xbf16>, vector<8x128xf32> -> vector<8x128xf32>
    %cst_180 = arith.constant 0.000000e+00 : f32
    %262 = vector.broadcast %cst_180 : f32 to vector<8x128xf32>
    %263 = arith.maximumf %261, %262 : vector<8x128xf32>
    %264 = arith.mulf %263, %263 : vector<8x128xf32>
    %c0_181 = arith.constant 0 : index
    %c384 = arith.constant 384 : index
    %265 = vector.load %arg23[%c0_181, %c384] : memref<8x512xf32, #tpu.memory_space<vmem>>, vector<8x128xf32>
    tpu.vector_store %arg23[%c0_181, %c384], %264 {strides = array<i32>} : memref<8x512xf32, #tpu.memory_space<vmem>>, vector<8x128xf32>,
    %c0_182 = arith.constant 0 : index
    %c0_183 = arith.constant 0 : index
    %266 = vector.load %arg23[%c0_182, %c0_183] : memref<8x512xf32, #tpu.memory_space<vmem>>, vector<8x512xf32>
    %267 = arith.truncf %266 : vector<8x512xf32> to vector<8x512xbf16>
    %c0_i32_184 = arith.constant 0 : i32
    %c0_i32_185 = arith.constant 0 : i32
    %c0_i32_186 = arith.constant 0 : i32
    %c0_i32_187 = arith.constant 0 : i32
    %c0_i32_188 = arith.constant 0 : i32
    %268 = tpu.memref_slice %arg10[%c0_i32_184, %c0_i32_187, %c0_i32_188] : memref<1x640x128xbf16, #tpu.memory_space<any>> -> memref<1x640x128xbf16, #tpu.memory_space<any>>
    %269 = tpu.memref_squeeze %268 : memref<1x640x128xbf16, #tpu.memory_space<any>> -> memref<640x128xbf16, #tpu.memory_space<any>>
    %c0_i32_189 = arith.constant 0 : i32
    %c0_i32_190 = arith.constant 0 : i32
    %270 = tpu.memref_slice %arg20[%c0_i32_185, %c0_i32_189, %c0_i32_190] : memref<2x640x128xbf16, #tpu.memory_space<vmem>> -> memref<1x640x128xbf16, #tpu.memory_space<vmem>>
    %271 = tpu.memref_squeeze %270 : memref<1x640x128xbf16, #tpu.memory_space<vmem>> -> memref<640x128xbf16, #tpu.memory_space<vmem>>
    %272 = tpu.memref_slice %arg27[%c0_i32_186] : memref<2x!tpu.dma_semaphore, #tpu.memory_space<semaphore_mem>> -> memref<1x!tpu.dma_semaphore, #tpu.memory_space<semaphore_mem>>
    %273 = tpu.memref_squeeze %272 : memref<1x!tpu.dma_semaphore, #tpu.memory_space<semaphore_mem>> -> memref<!tpu.dma_semaphore, #tpu.memory_space<semaphore_mem>>
    tpu.wait_dma2 semaphore(%273 : memref<!tpu.dma_semaphore, #tpu.memory_space<semaphore_mem>>) src(%269 : memref<640x128xbf16, #tpu.memory_space<any>>) dst(%271 : memref<640x128xbf16, #tpu.memory_space<vmem>>)
    %c0_191 = arith.constant 0 : index
    %c0_192 = arith.constant 0 : index
    %c0_193 = arith.constant 0 : index
    %274 = vector.load %arg20[%c0_191, %c0_192, %c0_193] : memref<2x640x128xbf16, #tpu.memory_space<vmem>>, vector<1x128x128xbf16>
    %275 = vector.shape_cast %274 : vector<1x128x128xbf16> to vector<128x128xbf16>
    %c0_194 = arith.constant 0 : index
    %c128_195 = arith.constant 128 : index
    %c0_196 = arith.constant 0 : index
    %276 = vector.load %arg20[%c0_194, %c128_195, %c0_196] : memref<2x640x128xbf16, #tpu.memory_space<vmem>>, vector<1x512x128xbf16>
    %277 = vector.shape_cast %276 : vector<1x512x128xbf16> to vector<512x128xbf16>
    %cst_197 = arith.constant dense<0.000000e+00> : vector<8x128xf32>
    %278 = tpu.matmul %195, %275, %cst_197 {dimension_numbers = #tpu.dot_dimension_numbers<[1], [0], [0], [1], [0, 0, 1, 1], [], []>} : vector<8x128xbf16>, vector<128x128xbf16>, vector<8x128xf32> -> vector<8x128xf32>
    %279 = arith.negf %278 : vector<8x128xf32>
    %280 = math.exp %279 : vector<8x128xf32>
    %cst_198 = arith.constant 1.000000e+00 : f32
    %281 = vector.broadcast %cst_198 : f32 to vector<8x128xf32>
    %282 = arith.addf %281, %280 : vector<8x128xf32>
    %283 = arith.divf %281, %282 : vector<8x128xf32>
    %cst_199 = arith.constant dense<0.000000e+00> : vector<8x128xf32>
    %284 = tpu.matmul %267, %277, %cst_199 {dimension_numbers = #tpu.dot_dimension_numbers<[1], [0], [0], [1], [0, 0, 1, 1], [], []>} : vector<8x512xbf16>, vector<512x128xbf16>, vector<8x128xf32> -> vector<8x128xf32>
    %285 = arith.mulf %283, %284 : vector<8x128xf32>
    %286 = arith.addf %159, %285 : vector<8x128xf32>
    %c0_200 = arith.constant 0 : index
    %c0_201 = arith.constant 0 : index
    %287 = vector.load %arg11[%c0_200, %c0_201] : memref<8x128xf32, #tpu.memory_space<vmem>>, vector<8x128xf32>
    tpu.vector_store %arg11[%c0_200, %c0_201], %286 {strides = array<i32>} : memref<8x128xf32, #tpu.memory_space<vmem>>, vector<8x128xf32>,
    %c0_202 = arith.constant 0 : index
    %c0_203 = arith.constant 0 : index
    %288 = vector.load %arg15[%c0_202, %c0_203] : memref<8x128xf32, #tpu.memory_space<vmem>>, vector<8x128xf32>
    tpu.vector_store %arg15[%c0_202, %c0_203], %72 {strides = array<i32>} : memref<8x128xf32, #tpu.memory_space<vmem>>, vector<8x128xf32>,
    %c0_204 = arith.constant 0 : index
    %c0_205 = arith.constant 0 : index
    %289 = vector.load %arg16[%c0_204, %c0_205] : memref<8x128xf32, #tpu.memory_space<vmem>>, vector<8x128xf32>
    tpu.vector_store %arg16[%c0_204, %c0_205], %183 {strides = array<i32>} : memref<8x128xf32, #tpu.memory_space<vmem>>, vector<8x128xf32>,
    return
  }
}

</mosaic_0001>

<bundles_post_ra>
// kernel: tpu_custom_call.1
= control target key start
LH: loop header
LB: loop body
LE: loop exit
PB: predicated region body
PF: predicated region fallthrough
CT: control target
= control target key end

     0   :  { %s2642_s0 = inlined_call_operand.vmem [shape: f32[16,128], index: 0, kind: input, shape index: {}]   ;;  %s2643_s1 = inlined_call_operand.hbm [shape: f32[8,128], index: 1, kind: input, shape index: {}, may-alias: {1,11}]   ;;  %s2644_s2 = inlined_call_operand.hbm [shape: f32[8,128], index: 2, kind: input, shape index: {}, may-alias: {2,12}]   ;;  %s2645_s3 = inlined_call_operand.hbm [shape: f32[8,128], index: 3, kind: input, shape index: {}, may-alias: {3,13}]   ;;  %s2646_s4 = inlined_call_operand.hbm [shape: f32[8,128], index: 4, kind: input, shape index: {}, may-alias: {4,14}]   ;;  %s2647_s5 = inlined_call_operand.hbm [shape: f32[8,128], index: 5, kind: input, shape index: {}, may-alias: {5,15}]   ;;  %s2648_s6 = inlined_call_operand.hbm [shape: f32[8,128], index: 6, kind: input, shape index: {}, may-alias: {6,16}]   ;;  %s2649_s7 = inlined_call_operand.hbm [shape: bf16[1,128,384], index: 7, kind: input, shape index: {}]   ;;  %s2650_s8 = inlined_call_operand.vmem [shape: bf16[1,128,128], index: 8, kind: input, shape index: {}]   ;;  %s2651_s9 = inlined_call_operand.hbm [shape: bf16[4,128,128], index: 9, kind: input, shape index: {}]   ;;  %s2652_s10 = inlined_call_operand.hbm [shape: bf16[1,640,128], index: 10, kind: input, shape index: {}]   ;;  %s2653_s11 = inlined_call_operand.hbm [shape: f32[8,128], index: 11, kind: output, shape index: {0}, may-alias: {1,11}]   ;;  %s2654_s12 = inlined_call_operand.hbm [shape: f32[8,128], index: 12, kind: output, shape index: {1}, may-alias: {2,12}]   ;;  %s2655_s13 = inlined_call_operand.hbm [shape: f32[8,128], index: 13, kind: output, shape index: {2}, may-alias: {3,13}]   ;;  %s2656_s14 = inlined_call_operand.hbm [shape: f32[8,128], index: 14, kind: output, shape index: {3}, may-alias: {4,14}]   ;;  %s2657_s15 = inlined_call_operand.hbm [shape: f32[8,128], index: 15, kind: output, shape index: {4}, may-alias: {5,15}]   ;;  %s2658_s16 = inlined_call_operand.hbm [shape: f32[8,128], index: 16, kind: output, shape index: {5}, may-alias: {6,16}]  }
   0x1   :  { %2660 = sst [smem:[#allocation63_spill]] %s2642_s0 }
   0x2   :  { %22 = vsyncpa [#allocation14], 0 }
   0x3   :  { %23 = vsyncpa [#allocation17], 0 }
   0x4   :  { %24 = vsyncpa [#allocation20], 0 }
   0x5   :  { %25 = vsyncpa [#allocation23], 0 }
   0x6   :  { %26 = vsyncpa [#allocation15], 0 }
   0x7   :  { %27 = vsyncpa [#allocation26], 0 }
   0x8   :  { %28 = vsyncpa [#allocation29], 0 }
   0x9   :  { %29 = vsyncpa [#allocation32], 0  ;;  %s1974_s21 = smov [#allocation16]   ;;  %s1975_s23 = smov [#allocation19]  }
   0xa   :  { %s48_s22 = sshll.u32 %s1974_s21, 4  ;;  %s68_s24 = sshll.u32 %s1975_s23, 4  ;;  %s49_s22 = int_to_ptr.vmem [resolvable:$true] %s48_s22  ;;  %s69_s24 = int_to_ptr.vmem [resolvable:$true] %s68_s24 }
   0xb   :  { %s1561_s27 = scalar_lea.hbm %s2644_s2, 128 }
   0xc   :  { %p1562_p0 = scmp.ne.s32.totalorder %s2644_s2, %s1561_s27  ;;  %p1565_p1 = scmp.lt.u32.totalorder %s1561_s27, %s2644_s2 }
   0xe   :  { %p1567_p2 = pnand %p1565_p1, %p1562_p0 }
  0x10   :  { %1570 = shalt.err (!%p1567_p2)
}
  0x11   :  { %s1571_s17 = scalar_lea.vmem %s49_s22, 128  ;;  %p1576_p4 = scmp.lt.s32.totalorder %s49_s22, %s49_s22 }
  0x12   :  { %p1572_p3 = scmp.ne.s32.totalorder %s49_s22, %s1571_s17  ;;  %p1577_p5 = scmp.lt.s32.totalorder %s1571_s17, %s1571_s17 }
  0x14   :  { %p1578_p6 = por %p1577_p5, %p1576_p4 }
  0x16   :  { %p1579_p7 = pnand %p1578_p6, %p1572_p3 }
  0x18   :  { %1582 = shalt.err (!%p1579_p7)
}
  0x19   :  { %51 = dma.hbm_to_vmem [thread:$0]  %s2644_s2, 128, %s49_s22, [#allocation17]  }
  0x1a   :  { %s1583_s23 = scalar_lea.hbm %s2646_s4, 128 }
  0x1b   :  { %p1584_p8 = scmp.ne.s32.totalorder %s2646_s4, %s1583_s23  ;;  %p1587_p9 = scmp.lt.u32.totalorder %s1583_s23, %s2646_s4 }
  0x1d   :  { %p1589_p10 = pnand %p1587_p9, %p1584_p8 }
  0x1f   :  { %1592 = shalt.err (!%p1589_p10)
}
  0x20   :  { %s1593_s29 = scalar_lea.vmem %s69_s24, 128  ;;  %p1598_p12 = scmp.lt.s32.totalorder %s69_s24, %s69_s24 }
  0x21   :  { %p1594_p11 = scmp.ne.s32.totalorder %s69_s24, %s1593_s29  ;;  %p1599_p13 = scmp.lt.s32.totalorder %s1593_s29, %s1593_s29 }
  0x23   :  { %p1600_p0 = por %p1599_p13, %p1598_p12 }
  0x25   :  { %p1601_p1 = pnand %p1600_p0, %p1594_p11 }
  0x27   :  { %1604 = shalt.err (!%p1601_p1)
}
  0x28   :  { %71 = dma.hbm_to_vmem [thread:$0]  %s2646_s4, 128, %s69_s24, [#allocation20]  }
  0x29   :  { %s1976_s30 = smov [#allocation13]   ;;  %s1977_s17 = smov [#allocation18]  }
  0x2a   :  { %s38_s0 = sshll.u32 %s1976_s30, 4  ;;  %s58_s18 = sshll.u32 %s1977_s17, 4  ;;  %s39_s0 = int_to_ptr.vmem [resolvable:$true] %s38_s0  ;;  %s59_s18 = int_to_ptr.vmem [resolvable:$true] %s58_s18 }
  0x2b   :  { %s1605_s21 = scalar_lea.hbm %s2643_s1, 128 }
  0x2c   :  { %p1606_p2 = scmp.ne.s32.totalorder %s2643_s1, %s1605_s21  ;;  %p1609_p3 = scmp.lt.u32.totalorder %s1605_s21, %s2643_s1 }
  0x2e   :  { %p1611_p4 = pnand %p1609_p3, %p1606_p2 }
  0x30   :  { %1614 = shalt.err (!%p1611_p4)
}
  0x31   :  { %s1615_s4 = scalar_lea.vmem %s39_s0, 128  ;;  %p1620_p6 = scmp.lt.s32.totalorder %s39_s0, %s39_s0 }
  0x32   :  { %p1616_p5 = scmp.ne.s32.totalorder %s39_s0, %s1615_s4  ;;  %p1621_p7 = scmp.lt.s32.totalorder %s1615_s4, %s1615_s4 }
  0x34   :  { %p1622_p8 = por %p1621_p7, %p1620_p6 }
  0x36   :  { %p1623_p9 = pnand %p1622_p8, %p1616_p5 }
  0x38   :  { %1626 = shalt.err (!%p1623_p9)
}
  0x39   :  { %41 = dma.hbm_to_vmem [thread:$0]  %s2643_s1, 128, %s39_s0, [#allocation14]  }
  0x3a   :  { %s1627_s22 = scalar_lea.hbm %s2645_s3, 128 }
  0x3b   :  { %p1628_p10 = scmp.ne.s32.totalorder %s2645_s3, %s1627_s22  ;;  %p1631_p11 = scmp.lt.u32.totalorder %s1627_s22, %s2645_s3 }
  0x3d   :  { %p1633_p12 = pnand %p1631_p11, %p1628_p10 }
  0x3f   :  { %1636 = shalt.err (!%p1633_p12)
}
  0x40   :  { %s1637_s21 = scalar_lea.vmem %s59_s18, 128  ;;  %p1642_p0 = scmp.lt.s32.totalorder %s59_s18, %s59_s18 }
  0x41   :  { %p1638_p13 = scmp.ne.s32.totalorder %s59_s18, %s1637_s21  ;;  %p1643_p1 = scmp.lt.s32.totalorder %s1637_s21, %s1637_s21 }
  0x43   :  { %p1644_p2 = por %p1643_p1, %p1642_p0 }
  0x45   :  { %p1645_p3 = pnand %p1644_p2, %p1638_p13 }
  0x47   :  { %1648 = shalt.err (!%p1645_p3)
}
  0x48   :  { %61 = dma.hbm_to_vmem [thread:$0]  %s2645_s3, 128, %s59_s18, [#allocation17]  }
  0x49   :  { %s1978_s23 = smov [#allocation21]   ;;  %s1979_s26 = smov [#allocation22]  }
  0x4a   :  { %s78_s25 = sshll.u32 %s1978_s23, 4  ;;  %s88_s27 = sshll.u32 %s1979_s26, 4  ;;  %s79_s25 = int_to_ptr.vmem [resolvable:$true] %s78_s25  ;;  %s89_s27 = int_to_ptr.vmem [resolvable:$true] %s88_s27 }
  0x4b   :  { %s1649_s28 = scalar_lea.hbm %s2647_s5, 128 }
  0x4c   :  { %p1650_p4 = scmp.ne.s32.totalorder %s2647_s5, %s1649_s28  ;;  %p1653_p5 = scmp.lt.u32.totalorder %s1649_s28, %s2647_s5 }
  0x4e   :  { %p1655_p6 = pnand %p1653_p5, %p1650_p4 }
  0x50   :  { %1658 = shalt.err (!%p1655_p6)
}
  0x51   :  { %s1659_s3 = scalar_lea.vmem %s79_s25, 128  ;;  %p1664_p8 = scmp.lt.s32.totalorder %s79_s25, %s79_s25 }
  0x52   :  { %p1660_p7 = scmp.ne.s32.totalorder %s79_s25, %s1659_s3  ;;  %p1665_p9 = scmp.lt.s32.totalorder %s1659_s3, %s1659_s3 }
  0x54   :  { %p1666_p10 = por %p1665_p9, %p1664_p8 }
  0x56   :  { %p1667_p11 = pnand %p1666_p10, %p1660_p7 }
  0x58   :  { %1670 = shalt.err (!%p1667_p11)
}
  0x59   :  { %81 = dma.hbm_to_vmem [thread:$0]  %s2647_s5, 128, %s79_s25, [#allocation20]  }
  0x5a   :  { %s1671_s21 = scalar_lea.hbm %s2648_s6, 128 }
  0x5b   :  { %p1672_p12 = scmp.ne.s32.totalorder %s2648_s6, %s1671_s21  ;;  %p1675_p13 = scmp.lt.u32.totalorder %s1671_s21, %s2648_s6 }
  0x5d   :  { %p1677_p0 = pnand %p1675_p13, %p1672_p12 }
  0x5f   :  { %1680 = shalt.err (!%p1677_p0)
}
  0x60   :  { %s1681_s4 = scalar_lea.vmem %s89_s27, 128  ;;  %p1686_p2 = scmp.lt.s32.totalorder %s89_s27, %s89_s27 }
  0x61   :  { %p1682_p1 = scmp.ne.s32.totalorder %s89_s27, %s1681_s4  ;;  %p1687_p3 = scmp.lt.s32.totalorder %s1681_s4, %s1681_s4 }
  0x63   :  { %p1688_p4 = por %p1687_p3, %p1686_p2 }
  0x65   :  { %p1689_p5 = pnand %p1688_p4, %p1682_p1 }
  0x67   :  { %1692 = shalt.err (!%p1689_p5)
}
  0x68   :  { %91 = dma.hbm_to_vmem [thread:$0]  %s2648_s6, 128, %s89_s27, [#allocation23]  }
  0x69   :  { %1944 = dma.done.wait [#allocation14], 128  }
  0x6a   :  { %1945 = vsyncadd [#allocation14], 4294967168 }
  0x6b   :  { %1946 = dma.done.wait [#allocation17], 256  }
  0x6c   :  { %1947 = vsyncadd [#allocation17], 4294967040 }
  0x6d   :  { %1948 = dma.done.wait [#allocation20], 256  }
  0x6e   :  { %1949 = vsyncadd [#allocation20], 4294967040 }
  0x6f   :  { %1950 = dma.done.wait [#allocation23], 128  }
  0x70   :  { %1951 = vsyncadd [#allocation23], 4294967168  ;;  %s115_s24 = sld [smem:[#allocation0]]   ;;  %s1980_s28 = smov 384  }
  0x71   :  { %127 = sst [smem:[#allocation34]] %s1980_s28  ;;  %s1981_s29 = smov 3  }
  0x72   :  { %129 = sst [smem:[#allocation34 + $0x1]] %s1980_s28  ;;  %s1982_s2 = smov 64  }
  0x73   :  { %131 = sst [smem:[#allocation34 + $0x2]] %s1981_s29  ;;  %s1983_s22 = smov 128  }
  0x74   :  { %133 = sst [smem:[#allocation34 + $0x3]] %s1982_s2  ;;  %s1984_s30 = smov 2  }
  0x75   :  { %135 = sst [smem:[#allocation34 + $0x4]] %s1983_s22  ;;  %s1985_s27 = smov 192  }
  0x76   :  { %137 = sst [smem:[#allocation34 + $0x5]] %s1984_s30  ;;  %s1180_s6 = sshll.u32 %s115_s24, 26 }
  0x77   :  { %139 = sst [smem:[#allocation34 + $0x6]] %s1985_s27  ;;  %s1181_s3 = sadd.s32 134217728, %s1180_s6 }
  0x78   :  { %141 = sst [smem:[#allocation34 + $0x7]] %s1982_s2  ;;  %s1986_s18 = smov 4  }
  0x79   :  { %143 = sst [smem:[#allocation34 + $0x8]] %s1986_s18  ;;  %s1987_s17 = smov [#allocation2]  }
  0x7a   :  { %s123_s19 = sshll.u32 %s1987_s17, 4  ;;  %s1988_s20 = smov [#allocation9]   ;;  %s124_s19 = int_to_ptr.vmem [resolvable:$true] %s123_s19 }
  0x7b   :  { %s1989_s21 = smov [#allocation33]  }
  0x7c   :  { %145 = dma.general %s2649_s7, 3072, %s124_s19, %s1988_s20, %s1989_s21, [#allocation34], %s1181_s3, 0  }
  0x7d   :  { %v2164_v0 = vld [vmem:[%s2650_s8] sm:$0xff]  ;;  %v2169_v1 = vld [vmem:[%s2650_s8 + $0x8] sm:$0xff]  ;;  %v2174_v2 = vld [vmem:[%s2650_s8 + $0x10] sm:$0xff] }
  0x7e   :  { %v2179_v3 = vld [vmem:[%s2650_s8 + $0x18] sm:$0xff]  ;;  %v2184_v4 = vld [vmem:[%s2650_s8 + $0x20] sm:$0xff]  ;;  %v2189_v5 = vld [vmem:[%s2650_s8 + $0x28] sm:$0xff] }
  0x7f   :  { %v2194_v6 = vld [vmem:[%s2650_s8 + $0x30] sm:$0xff]  ;;  %v2199_v7 = vld [vmem:[%s2650_s8 + $0x38] sm:$0xff]  ;;  %v224_v8 = vld [vmem:[#allocation13] sm:$0xff] }
  0x80   :  { %201 = vsyncadd [#allocation10], 1024  ;;  %227 = vadd.xlane.f32.xlu0 %v224_v8  ;;  %v231_v9 = vmul.f32 %v224_v8, %v224_v8  ;;  %s2661_s20 = sld [smem:[#allocation63_spill]]  ;;  %s1990_s1 = smov [#allocation4]  }
  0x81   :  { %s209_s0 = sshll.u32 %s1990_s1, 4  ;;  %s1991_s23 = smov [#allocation5]   ;;  %s2212_s0 = int_to_ptr.vmem [resolvable:$true] %s209_s0 }
  0x82   :  { %s220_s26 = sshll.u32 %s1991_s23, 4  ;;  %s2219_s25 = scalar_lea.hbm %s2651_s9, 1024  ;;  %s2214_s26 = int_to_ptr.vmem [resolvable:$true] %s220_s26 }
  0x83   :  { %p1694_p6 = scmp.ne.s32.totalorder %s2651_s9, %s2219_s25  ;;  %s2228_s2 = scalar_lea.hbm %s2651_s9, 4096 }
  0x84   :  { %232 = vadd.xlane.f32.xlu0 %v231_v9  ;;  %p1696_p7 = scmp.lt.u32.totalorder %s2228_s2, %s2219_s25  ;;  %p1697_p8 = scmp.lt.u32.totalorder %s2219_s25, %s2651_s9 }
  0x86   :  { %v1182_v19 = vld [vmem:[%s2661_s20] ss:$0 sm:$0xff]  ;;  %v1183_v21 = vld [vmem:[%s2661_s20 + $0x1] ss:$0 sm:$0xff]  ;;  %p1698_p9 = por %p1697_p8, %p1696_p7 }
  0x88   :  { %p1699_p10 = pnand %p1698_p9, %p1694_p6 }
 0x10d   :  { %v228_v10 = vpop.xlane.xlu0 %227 }
 0x10e   :  { %v230_v11 = vmul.f32 0.0078125, %v228_v10 }
 0x110   :  { %v235_v13 = vmul.f32 %v230_v11, %v230_v11  ;;  %v237_v17 = vsub.f32 %v224_v8, %v230_v11 }
 0x111   :  { %v233_v12 = vpop.xlane.xlu0 %232 }
 0x112   :  { %v234_v14 = vmul.f32 0.0078125, %v233_v12 }
 0x114   :  { %v236_v15 = vsub.f32 %v234_v14, %v235_v13 }
 0x116   :  { %v238_v16 = vadd.f32 1e-05, %v236_v15 }
 0x118   :  { %1537 = vrsqrt.f32 %v238_v16 }
 0x122   :  { %v1538_v18 = vpop.eup %1537 }
 0x123   :  { %v240_v20 = vmul.f32 %v1538_v18, %v237_v17 }
 0x125   :  { %v245_v22 = vmul.f32 %v1182_v19, %v240_v20 }
 0x127   :  { %v2207_v23 = vadd.f32 %v1183_v21, %v245_v22 }
 0x129   :  { %253 = vadd.xlane.f32.xlu1 %v2207_v23  ;;  %v256_v24 = vmul.f32 %v2207_v23, %v2207_v23 }
 0x12d   :  { %257 = vadd.xlane.f32.xlu1 %v256_v24 }
 0x12e   :  { %1702 = shalt.err (!%p1699_p10)  }
 0x12f   :  { %s1703_s3 = scalar_lea.vmem %s2212_s0, 1024  ;;  %s1707_s17 = scalar_lea.vmem %s2212_s0, 2048 }
 0x130   :  { %p2243_p11 = scmp.ne.s32.totalorder %s2212_s0, %s1703_s3  ;;  %p1708_p12 = scmp.lt.s32.totalorder %s2212_s0, %s2212_s0 }
 0x131   :  { %p1709_p13 = scmp.lt.s32.totalorder %s1707_s17, %s1703_s3 }
 0x133   :  { %p2252_p0 = por %p1709_p13, %p1708_p12 }
 0x135   :  { %p1711_p1 = pnand %p2252_p0, %p2243_p11 }
 0x137   :  { %1714 = shalt.err (!%p1711_p1)  }
 0x138   :  { %212 = dma.hbm_to_vmem [thread:$0]  %s2651_s9, 1024, %s2212_s0, [#allocation11] }
 0x139   :  { %s1715_s4 = scalar_lea.hbm %s2652_s10, 5120 }
 0x13a   :  { %p1716_p2 = scmp.ne.s32.totalorder %s2652_s10, %s1715_s4  ;;  %p1719_p3 = scmp.lt.u32.totalorder %s1715_s4, %s2652_s10 }
 0x13c   :  { %p1721_p4 = pnand %p1719_p3, %p1716_p2 }
 0x13e   :  { %1724 = shalt.err (!%p1721_p4)  }
 0x13f   :  { %s1725_s7 = scalar_lea.vmem %s2214_s26, 5120  ;;  %s1729_s22 = scalar_lea.vmem %s2214_s26, 10240 }
 0x140   :  { %p1726_p5 = scmp.ne.s32.totalorder %s2214_s26, %s1725_s7  ;;  %p1730_p6 = scmp.lt.s32.totalorder %s2214_s26, %s2214_s26 }
 0x141   :  { %p1731_p7 = scmp.lt.s32.totalorder %s1729_s22, %s1725_s7 }
 0x143   :  { %p1732_p9 = por %p1731_p7, %p1730_p6 }
 0x145   :  { %p1733_p10 = pnand %p1732_p9, %p1726_p5 }
 0x147   :  { %1736 = shalt.err (!%p1733_p10)  }
 0x148   :  { %223 = dma.hbm_to_vmem [thread:$0]  %s2652_s10, 5120, %s2214_s26, [#allocation12]  ;;  %v1184_v34 = vld [vmem:[%s2661_s20 + $0x2] ss:$0 sm:$0xff]  ;;  %v1185_v36 = vld [vmem:[%s2661_s20 + $0x3] ss:$0 sm:$0xff] }
 0x149   :  { %v276_v38 = vld [vmem:[#allocation21] sm:$0xff]  ;;  %v1186_v40 = vld [vmem:[%s2661_s20 + $0x8] ss:$0 sm:$0xff]  ;;  %v1187_v41 = vld [vmem:[%s2661_s20 + $0x9] ss:$0 sm:$0xff] }
 0x14a   :  { %v1188_v42 = vld [vmem:[%s2661_s20 + $0xa] ss:$0 sm:$0xff] }
 0x1b6   :  { %v254_v25 = vpop.xlane.xlu1 %253 }
 0x1b7   :  { %v255_v26 = vmul.f32 0.0078125, %v254_v25 }
 0x1b9   :  { %v260_v28 = vmul.f32 %v255_v26, %v255_v26  ;;  %v262_v32 = vsub.f32 %v2207_v23, %v255_v26 }
 0x1ba   :  { %v258_v27 = vpop.xlane.xlu1 %257 }
 0x1bb   :  { %v259_v29 = vmul.f32 0.0078125, %v258_v27 }
 0x1bd   :  { %v261_v30 = vsub.f32 %v259_v29, %v260_v28 }
 0x1bf   :  { %v263_v31 = vadd.f32 1e-05, %v261_v30 }
 0x1c1   :  { %1539 = vrsqrt.f32 %v263_v31 }
 0x1cb   :  { %v1540_v33 = vpop.eup %1539 }
 0x1cc   :  { %v265_v35 = vmul.f32 %v1540_v33, %v262_v32 }
 0x1ce   :  { %v270_v37 = vmul.f32 %v1184_v34, %v265_v35 }
 0x1d0   :  { %v2294_v39 = vadd.f32 %v1185_v36, %v270_v37 }
 0x1d2   :  { %v277_v43 = vsub.f32 %v2294_v39, %v276_v38 }
 0x1d4   :  { %v283_v44 = vmul.f32 %v1186_v40, %v277_v43  ;;  %v291_v45 = vmul.f32 %v1187_v41, %v277_v43  ;;  %v299_v46 = vmul.f32 %v1188_v42, %v277_v43 }
 0x1d6   :  { %v284_v47 = vadd.f32 %v283_v44, %v276_v38  ;;  %v2306_v48 = vadd.f32 %v291_v45, %v276_v38  ;;  %v2308_v49 = vadd.f32 %v299_v46, %v276_v38 }
 0x1d8   :  { %v285_v50 = vpack.c.bf16 %v284_v47, %v284_v47  ;;  %v293_v51 = vpack.c.bf16 %v2306_v48, %v2306_v48  ;;  %v301_v52 = vpack.c.bf16 %v2308_v49, %v2308_v49 }
 0x1d9   :  { %1952 = dma.done.wait [#allocation9], 3072 }
 0x1da   :  { %1953 = vsyncadd [#allocation9], 4294964224  ;;  %v1992_v53 = vmov 0.0   ;;  %vm1993_vm0 = vmmov 0   ;;  %v306_v54 = vld [vmem:[#allocation2] sm:$0xff]  ;;  %v314_v55 = vld [vmem:[#allocation2 + $0x8] sm:$0xff] }
 0x1db   :  { %1330 = vmatprep.subr.bf16.mxu0 %v1992_v53  ;;  %1350 = vmatprep.subr.bf16.mxu1 %v1992_v53  ;;  %v307_v56 = vld [vmem:[#allocation2 + $0x18] sm:$0xff]  ;;  %v315_v57 = vld [vmem:[#allocation2 + $0x20] sm:$0xff]  ;;  %v308_v58 = vld [vmem:[#allocation2 + $0x30] sm:$0xff] }
 0x1dc   :  { %1346 = vmatprep.mubr.msk.bf16.mxu0 %vm1993_vm0, %v1992_v53  ;;  %1366 = vmatprep.mubr.msk.bf16.mxu1 %vm1993_vm0, %v1992_v53  ;;  %v316_v59 = vld [vmem:[#allocation2 + $0x38] sm:$0xff]  ;;  %v309_v60 = vld [vmem:[#allocation2 + $0x48] sm:$0xff]  ;;  %v317_v61 = vld [vmem:[#allocation2 + $0x50] sm:$0xff] }
 0x1dd   :  { %1331 = vmatpush3.bf16.msra.mxu0 %v306_v54  ;;  %1351 = vmatpush3.bf16.msra.mxu1 %v314_v55  ;;  %v310_v62 = vld [vmem:[#allocation2 + $0x60] sm:$0xff]  ;;  %v318_v63 = vld [vmem:[#allocation2 + $0x68] sm:$0xff]  ;;  %v311_v8 = vld [vmem:[#allocation2 + $0x78] sm:$0xff] }
 0x1de   :  { %1332 = vmatprep.subr.bf16.mxu0 %v1992_v53  ;;  %1352 = vmatprep.subr.bf16.mxu1 %v1992_v53  ;;  %v319_v9 = vld [vmem:[#allocation2 + $0x80] sm:$0xff]  ;;  %v312_v10 = vld [vmem:[#allocation2 + $0x90] sm:$0xff]  ;;  %v320_v11 = vld [vmem:[#allocation2 + $0x98] sm:$0xff] }
 0x1df   :  { %v313_v12 = vld [vmem:[#allocation2 + $0xa8] sm:$0xff]  ;;  %v321_v13 = vld [vmem:[#allocation2 + $0xb0] sm:$0xff]  ;;  %v324_v16 = vld [vmem:[#allocation2 + $0x40] sm:$0xff] }
 0x1e0   :  { %v322_v14 = vld [vmem:[#allocation2 + $0x10] sm:$0xff]  ;;  %v323_v15 = vld [vmem:[#allocation2 + $0x28] sm:$0xff]  ;;  %v325_v17 = vld [vmem:[#allocation2 + $0x58] sm:$0xff] }
 0x1e1   :  { %1333 = vmatpush3.bf16.msra.mxu0 %v307_v56  ;;  %1353 = vmatpush3.bf16.msra.mxu1 %v315_v57  ;;  %v326_v18 = vld [vmem:[#allocation2 + $0x70] sm:$0xff]  ;;  %v327_v19 = vld [vmem:[#allocation2 + $0x88] sm:$0xff]  ;;  %v328_v20 = vld [vmem:[#allocation2 + $0xa0] sm:$0xff] }
 0x1e2   :  { %1334 = vmatprep.subr.bf16.mxu0 %v1992_v53  ;;  %1354 = vmatprep.subr.bf16.mxu1 %v1992_v53  ;;  %v329_v21 = vld [vmem:[#allocation2 + $0xb8] sm:$0xff]  ;;  %v1191_v24 = vld [vmem:[%s2661_s20 + $0x6] ss:$0 sm:$0xff]  ;;  %v1190_v26 = vld [vmem:[%s2661_s20 + $0x7] ss:$0 sm:$0xff] }
 0x1e3   :  { %v458_v22 = vld [vmem:[#allocation19] sm:$0xff]  ;;  %v457_v47 = vld [vmem:[#allocation18] sm:$0xff]  ;;  %v456_v48 = vld [vmem:[#allocation16] sm:$0xff] }
 0x1e4   :  { %v482_v25 = vadd.f32 %v1191_v24, %v458_v22 }
 0x1e5   :  { %1335 = vmatpush3.bf16.msra.mxu0 %v308_v58  ;;  %1355 = vmatpush3.bf16.msra.mxu1 %v316_v59 }
 0x1e6   :  { %1336 = vmatprep.subr.bf16.mxu0 %v1992_v53  ;;  %1356 = vmatprep.subr.bf16.mxu1 %v1992_v53 }
 0x1e9   :  { %1337 = vmatpush3.bf16.msra.mxu0 %v309_v60  ;;  %1357 = vmatpush3.bf16.msra.mxu1 %v317_v61 }
 0x1ea   :  { %1338 = vmatprep.subr.bf16.mxu0 %v1992_v53  ;;  %1358 = vmatprep.subr.bf16.mxu1 %v1992_v53 }
 0x1ed   :  { %1339 = vmatpush3.bf16.msra.mxu0 %v310_v62  ;;  %1359 = vmatpush3.bf16.msra.mxu1 %v318_v63 }
 0x1ee   :  { %1340 = vmatprep.subr.bf16.mxu0 %v1992_v53  ;;  %1360 = vmatprep.subr.bf16.mxu1 %v1992_v53 }
 0x1f1   :  { %1341 = vmatpush3.bf16.msra.mxu0 %v311_v8  ;;  %1361 = vmatpush3.bf16.msra.mxu1 %v319_v9 }
 0x1f2   :  { %1342 = vmatprep.subr.bf16.mxu0 %v1992_v53  ;;  %1362 = vmatprep.subr.bf16.mxu1 %v1992_v53 }
 0x1f5   :  { %1343 = vmatpush3.bf16.msra.mxu0 %v312_v10  ;;  %1363 = vmatpush3.bf16.msra.mxu1 %v320_v11 }
 0x1f6   :  { %1344 = vmatprep.subr.bf16.mxu0 %v1992_v53  ;;  %1364 = vmatprep.subr.bf16.mxu1 %v1992_v53 }
 0x1f9   :  { %1345 = vmatpush3.bf16.msra.mxu0 %v313_v12  ;;  %1365 = vmatpush3.bf16.msra.mxu1 %v321_v13 }
 0x1fa   :  { %1370 = vmatprep.subr.bf16.mxu0 %v1992_v53  ;;  %1390 = vmatprep.subr.bf16.mxu1 %v1992_v53 }
 0x1fc   :  { %1347 = vmatmul.mubr.bf16.vlgmr.msra.gmra.mrb[0].mxu0 %v285_v50  ;;  %1367 = vmatmul.mubr.bf16.vlgmr.msra.gmra.mrb[0].mxu1 %v293_v51 }
 0x1fd   :  { %1371 = vmatpush3.bf16.msra.mxu0 %v322_v14  ;;  %1386 = vmatprep.mubr.msk.bf16.mxu0 %vm1993_vm0, %v1992_v53 }
 0x1fe   :  { %1372 = vmatprep.subr.bf16.mxu0 %v1992_v53  ;;  %1406 = vmatprep.mubr.msk.bf16.mxu1 %vm1993_vm0, %v1992_v53 }
 0x201   :  { %1373 = vmatpush3.bf16.msra.mxu0 %v323_v15 }
 0x202   :  { %1374 = vmatprep.subr.bf16.mxu0 %v1992_v53 }
 0x205   :  { %1375 = vmatpush3.bf16.msra.mxu0 %v324_v16 }
 0x206   :  { %1376 = vmatprep.subr.bf16.mxu0 %v1992_v53 }
 0x209   :  { %1377 = vmatpush3.bf16.msra.mxu0 %v325_v17 }
 0x20a   :  { %1378 = vmatprep.subr.bf16.mxu0 %v1992_v53 }
 0x20d   :  { %1379 = vmatpush3.bf16.msra.mxu0 %v326_v18 }
 0x20e   :  { %1380 = vmatprep.subr.bf16.mxu0 %v1992_v53 }
 0x211   :  { %1381 = vmatpush3.bf16.msra.mxu0 %v327_v19 }
 0x212   :  { %1382 = vmatprep.subr.bf16.mxu0 %v1992_v53 }
 0x215   :  { %1383 = vmatpush3.bf16.msra.mxu0 %v328_v20 }
 0x216   :  { %1384 = vmatprep.subr.bf16.mxu0 %v1992_v53 }
 0x219   :  { %1385 = vmatpush3.bf16.msra.mxu0 %v329_v21 }
 0x21c   :  { %1387 = vmatmul.mubr.bf16.vlgmr.msra.gmra.mrb[4].mxu0 %v301_v52 }
 0x2cf   :  { %v364_v27 = vpop.f32.mrb[0].mxu0  ;;  %v404_v31 = vpop.f32.mrb[0].mxu1 }
 0x2d0   :  { %v465_v28 = vadd.f32 %v1190_v26, %v364_v27  ;;  %v483_v29 = vmax.f32 %v482_v25, %v364_v27  ;;  %v1348_v30 = vpop.f32.mrb[1].mxu0  ;;  %v1368_v33 = vpop.f32.mrb[1].mxu1 }
 0x2d1   :  { %v367_v32 = vpop.f32.mrb[2].mxu0  ;;  %v407_v38 = vpop.f32.mrb[2].mxu1 }
 0x2d2   :  { %v466_v34 = vmax.f32 %v458_v22, %v465_v28  ;;  %v484_v35 = vsub.f32 %v482_v25, %v483_v29  ;;  %v487_v36 = vsub.f32 %v364_v27, %v483_v29  ;;  %497 = vst [vmem:[#allocation28] sm:$0xff] %v483_v29  ;;  %v1349_v37 = vpop.f32.mrb[3].mxu0  ;;  %v1369_v40 = vpop.f32.mrb[3].mxu1 }
 0x2d4   :  { %v467_v41 = vsub.f32 %v458_v22, %v466_v34  ;;  %v470_v42 = vsub.f32 %v465_v28, %v466_v34  ;;  %v485_v43 = vmul.f32 1.442695, %v484_v35  ;;  %v488_v44 = vmul.f32 1.442695, %v487_v36 }
 0x2d6   :  { %v468_v45 = vmul.f32 1.442695, %v467_v41  ;;  %v471_v46 = vmul.f32 1.442695, %v470_v42  ;;  %1541 = vpow2.f32 %v485_v43 }
 0x2d7   :  { %1543 = vpow2.f32 %v488_v44 }
 0x2d8   :  { %1545 = vpow2.f32 %v468_v45 }
 0x2d9   :  { %1547 = vpow2.f32 %v471_v46 }
 0x2e0   :  { %v1542_v49 = vpop.eup %1541 }
 0x2e1   :  { %v1544_v50 = vpop.eup %1543  ;;  %v494_v51 = vmul.f32 %v1542_v49, %v457_v47  ;;  %v490_v52 = vmul.f32 %v1542_v49, %v456_v48 }
 0x2e2   :  { %v1546_v54 = vpop.eup %1545  ;;  %v491_v55 = vmul.f32 %v1544_v50, %v404_v31 }
 0x2e3   :  { %v1548_v56 = vpop.eup %1547  ;;  %v495_v57 = vadd.f32 %v1544_v50, %v494_v51  ;;  %v473_v58 = vmul.f32 %v1546_v54, %v456_v48  ;;  %v476_v11 = vmul.f32 %v1546_v54, %v457_v47 }
 0x2e4   :  { %v474_v59 = vmul.f32 %v1548_v56, %v404_v31  ;;  %v492_v60 = vadd.f32 %v491_v55, %v490_v52 }
 0x2e5   :  { %496 = vst [vmem:[#allocation27] sm:$0xff] %v495_v57  ;;  %v477_v13 = vadd.f32 %v1548_v56, %v476_v11 }
 0x2e6   :  { %v475_v61 = vadd.f32 %v474_v59, %v473_v58  ;;  %493 = vst [vmem:[#allocation25] sm:$0xff] %v492_v60 }
 0x2ef   :  { %v444_v62 = vpop.f32.mrb[4].mxu0 }
 0x2f0   :  { %v1189_v63 = vmul.f32 -1.442695, %v444_v62  ;;  %v1388_v8 = vpop.f32.mrb[5].mxu0 }
 0x2f1   :  { %v447_v9 = vpop.f32.mrb[6].mxu0 }
 0x2f2   :  { %1549 = vpow2.f32 %v1189_v63  ;;  %v1389_v10 = vpop.f32.mrb[7].mxu0 }
 0x2fc   :  { %v1550_v12 = vpop.eup %1549 }
 0x2fd   :  { %v453_v14 = vadd.f32 1.0, %v1550_v12 }
 0x2ff   :  { %1551 = vrcp.f32 %v453_v14 }
 0x300   :  { %1553 = vrcp.f32 %v477_v13 }
 0x309   :  { %v1552_v15 = vpop.eup %1551 }
 0x30a   :  { %v498_v16 = vmul.f32 %v1552_v15, %v475_v61  ;;  %v1554_v17 = vpop.eup %1553 }
 0x30c   :  { %v500_v18 = vmul.f32 %v1554_v17, %v498_v16 }
 0x30e   :  { %v503_v19 = vpack.c.bf16 %v500_v18, %v500_v18 }
 0x30f   :  { %1954 = dma.done.wait [#allocation10], 1024 }
 0x310   :  { %1955 = vsyncadd [#allocation10], 4294966272  ;;  %1391 = vmatpush3.bf16.msra.mxu1 %v2164_v0  ;;  %s1994_s22 = smov [#allocation4 + $0x40]   ;;  %s2382_s3 = scalar_lea.hbm %s2651_s9, 2048 }
 0x311   :  { %1392 = vmatprep.subr.bf16.mxu1 %v1992_v53  ;;  %s611_s30 = sshll.u32 %s1994_s22, 4  ;;  %p1738_p12 = scmp.ne.s32.totalorder %s2219_s25, %s2382_s3  ;;  %s2377_s30 = int_to_ptr.vmem [resolvable:$true] %s611_s30 }
 0x312   :  { %p1741_p13 = scmp.lt.u32.totalorder %s2228_s2, %s2382_s3  ;;  %p1743_p3 = scmp.lt.u32.totalorder %s2382_s3, %s2219_s25 }
 0x314   :  { %1393 = vmatpush3.bf16.msra.mxu1 %v2169_v1  ;;  %p1742_p2 = por %p1741_p13, %p1697_p8 }
 0x315   :  { %1394 = vmatprep.subr.bf16.mxu1 %v1992_v53 }
 0x316   :  { %p1744_p4 = por %p1743_p3, %p1742_p2 }
 0x318   :  { %1395 = vmatpush3.bf16.msra.mxu1 %v2174_v2  ;;  %p1745_p5 = pnand %p1744_p4, %p1738_p12 }
 0x319   :  { %1396 = vmatprep.subr.bf16.mxu1 %v1992_v53 }
 0x31c   :  { %1397 = vmatpush3.bf16.msra.mxu1 %v2179_v3 }
 0x31d   :  { %1398 = vmatprep.subr.bf16.mxu1 %v1992_v53 }
 0x320   :  { %1399 = vmatpush3.bf16.msra.mxu1 %v2184_v4 }
 0x321   :  { %1400 = vmatprep.subr.bf16.mxu1 %v1992_v53 }
 0x324   :  { %1401 = vmatpush3.bf16.msra.mxu1 %v2189_v5 }
 0x325   :  { %1402 = vmatprep.subr.bf16.mxu1 %v1992_v53 }
 0x328   :  { %1403 = vmatpush3.bf16.msra.mxu1 %v2194_v6 }
 0x329   :  { %1404 = vmatprep.subr.bf16.mxu1 %v1992_v53 }
 0x32c   :  { %1405 = vmatpush3.bf16.msra.mxu1 %v2199_v7 }
 0x32f   :  { %1407 = vmatmul.mubr.bf16.vlgmr.msra.gmra.mrb[4].mxu1 %v503_v19 }
 0x402   :  { %v549_v0 = vpop.f32.mrb[4].mxu1 }
 0x403   :  { %v2372_v1 = vadd.f32 %v549_v0, %v2207_v23  ;;  %v1408_v2 = vpop.f32.mrb[5].mxu1 }
 0x404   :  { %v552_v3 = vpop.f32.mrb[6].mxu1 }
 0x405   :  { %560 = vadd.xlane.f32.xlu0 %v2372_v1  ;;  %v1409_v4 = vpop.f32.mrb[7].mxu1  ;;  %v563_v5 = vmul.f32 %v2372_v1, %v2372_v1 }
 0x409   :  { %564 = vadd.xlane.f32.xlu0 %v563_v5 }
 0x40a   :  { %1748 = shalt.err (!%p1745_p5)  }
 0x40b   :  { %s1749_s10 = scalar_lea.vmem %s2377_s30, 1024  ;;  %p1754_p7 = scmp.lt.s32.totalorder %s2377_s30, %s2212_s0 }
 0x40c   :  { %p2397_p6 = scmp.ne.s32.totalorder %s2377_s30, %s1749_s10  ;;  %p1755_p9 = scmp.lt.s32.totalorder %s1707_s17, %s1749_s10 }
 0x40e   :  { %p2405_p8 = por %p1755_p9, %p1754_p7 }
 0x410   :  { %p1757_p10 = pnand %p2405_p8, %p2397_p6 }
 0x412   :  { %1760 = shalt.err (!%p1757_p10)  }
 0x413   :  { %614 = dma.hbm_to_vmem [thread:$0]  %s2219_s25, 1024, %s2377_s30, [#allocation11 + $0x1]  ;;  %v1192_v27 = vld [vmem:[%s2661_s20 + $0x4] ss:$0 sm:$0xff]  ;;  %v1193_v29 = vld [vmem:[%s2661_s20 + $0x5] ss:$0 sm:$0xff] }
 0x414   :  { %v583_v31 = vld [vmem:[#allocation22] sm:$0xff] }
 0x415   :  { %v1194_v33 = vld [vmem:[%s2661_s20 + $0xb] ss:$0 sm:$0xff]  ;;  %v1195_v34 = vld [vmem:[%s2661_s20 + $0xc] ss:$0 sm:$0xff] }
 0x492   :  { %v561_v6 = vpop.xlane.xlu0 %560 }
 0x493   :  { %v562_v7 = vmul.f32 0.0078125, %v561_v6 }
 0x495   :  { %v567_v20 = vmul.f32 %v562_v7, %v562_v7  ;;  %v569_v25 = vsub.f32 %v2372_v1, %v562_v7 }
 0x496   :  { %v565_v23 = vpop.xlane.xlu0 %564 }
 0x497   :  { %v566_v21 = vmul.f32 0.0078125, %v565_v23 }
 0x499   :  { %v568_v22 = vsub.f32 %v566_v21, %v567_v20 }
 0x49b   :  { %v570_v24 = vadd.f32 1e-05, %v568_v22 }
 0x49d   :  { %1555 = vrsqrt.f32 %v570_v24 }
 0x4a7   :  { %v1556_v26 = vpop.eup %1555 }
 0x4a8   :  { %v572_v28 = vmul.f32 %v1556_v26, %v569_v25 }
 0x4aa   :  { %v577_v30 = vmul.f32 %v1192_v27, %v572_v28 }
 0x4ac   :  { %v2427_v32 = vadd.f32 %v1193_v29, %v577_v30 }
 0x4ae   :  { %v584_v35 = vsub.f32 %v2427_v32, %v583_v31 }
 0x4b0   :  { %v590_v36 = vmul.f32 %v1194_v33, %v584_v35  ;;  %v598_v37 = vmul.f32 %v1195_v34, %v584_v35 }
 0x4b2   :  { %v591_v38 = vadd.f32 %v590_v36, %v583_v31  ;;  %v2436_v40 = vadd.f32 %v598_v37, %v583_v31 }
 0x4b4   :  { %v2438_v41 = vpack.c.bf16 %v591_v38, %v591_v38  ;;  %v600_v42 = vpack.c.bf16 %v2436_v40, %v2436_v40 }
 0x4b5   :  { %1956 = dma.done.wait [#allocation11], 1024 }
 0x4b6   :  { %1957 = vsyncadd [#allocation11], 4294966272  ;;  %1410 = vmatprep.subr.bf16.mxu0 %v1992_v53  ;;  %1426 = vmatprep.mubr.msk.bf16.mxu0 %vm1993_vm0, %v1992_v53  ;;  %v617_v43 = vld [vmem:[#allocation4] sm:$0xff]  ;;  %v618_v44 = vld [vmem:[#allocation4 + $0x8] sm:$0xff]  ;;  %s2456_s22 = scalar_lea.hbm %s2651_s9, 3072  ;;  %p1765_p13 = scmp.lt.u32.totalorder %s2382_s3, %s2651_s9 }
 0x4b7   :  { %1411 = vmatpush3.bf16.msra.mxu0 %v617_v43  ;;  %v619_v45 = vld [vmem:[#allocation4 + $0x10] sm:$0xff]  ;;  %v620_v46 = vld [vmem:[#allocation4 + $0x18] sm:$0xff]  ;;  %v621_v47 = vld [vmem:[#allocation4 + $0x20] sm:$0xff]  ;;  %p1763_p12 = scmp.ne.s32.totalorder %s2382_s3, %s2456_s22  ;;  %p1766_p2 = scmp.lt.u32.totalorder %s2228_s2, %s2456_s22 }
 0x4b8   :  { %1412 = vmatprep.subr.bf16.mxu0 %v1992_v53  ;;  %v622_v48 = vld [vmem:[#allocation4 + $0x28] sm:$0xff]  ;;  %v623_v49 = vld [vmem:[#allocation4 + $0x30] sm:$0xff]  ;;  %v624_v50 = vld [vmem:[#allocation4 + $0x38] sm:$0xff]  ;;  %p1768_p4 = scmp.lt.u32.totalorder %s2456_s22, %s2382_s3 }
 0x4b9   :  { %p1767_p3 = por %p1766_p2, %p1765_p13 }
 0x4bb   :  { %1413 = vmatpush3.bf16.msra.mxu0 %v618_v44  ;;  %p1769_p5 = por %p1768_p4, %p1767_p3 }
 0x4bc   :  { %1414 = vmatprep.subr.bf16.mxu0 %v1992_v53 }
 0x4bd   :  { %p1770_p7 = pnand %p1769_p5, %p1763_p12 }
 0x4bf   :  { %1415 = vmatpush3.bf16.msra.mxu0 %v619_v45 }
 0x4c0   :  { %1416 = vmatprep.subr.bf16.mxu0 %v1992_v53 }
 0x4c3   :  { %1417 = vmatpush3.bf16.msra.mxu0 %v620_v46 }
 0x4c4   :  { %1418 = vmatprep.subr.bf16.mxu0 %v1992_v53 }
 0x4c7   :  { %1419 = vmatpush3.bf16.msra.mxu0 %v621_v47 }
 0x4c8   :  { %1420 = vmatprep.subr.bf16.mxu0 %v1992_v53 }
 0x4cb   :  { %1421 = vmatpush3.bf16.msra.mxu0 %v622_v48 }
 0x4cc   :  { %1422 = vmatprep.subr.bf16.mxu0 %v1992_v53 }
 0x4cf   :  { %1423 = vmatpush3.bf16.msra.mxu0 %v623_v49 }
 0x4d0   :  { %1424 = vmatprep.subr.bf16.mxu0 %v1992_v53 }
 0x4d3   :  { %1425 = vmatpush3.bf16.msra.mxu0 %v624_v50 }
 0x4d6   :  { %1427 = vmatmul.mubr.bf16.vlgmr.msra.gmra.mrb[8].mxu0 %v2438_v41 }
 0x4d7   :  { %1773 = shalt.err (!%p1770_p7)  }
 0x4d8   :  { %1785 = shalt.err (!%p1711_p1)  }
 0x4d9   :  { %679 = dma.hbm_to_vmem [thread:$0]  %s2382_s3, 1024, %s2212_s0, [#allocation11] }
 0x5a9   :  { %v659_v51 = vpop.f32.mrb[8].mxu0 }
 0x5aa   :  { %v665_v52 = vmax.f32 %v659_v51, 0.0  ;;  %v1428_v54 = vpop.f32.mrb[9].mxu0 }
 0x5ab   :  { %v662_v55 = vpop.f32.mrb[10].mxu0 }
 0x5ac   :  { %v2478_v56 = vmul.f32 %v665_v52, %v665_v52  ;;  %v1429_v57 = vpop.f32.mrb[11].mxu0 }
 0x5ad   :  { %1958 = dma.done.wait [#allocation11 + $0x1], 1024 }
 0x5ae   :  { %1959 = vsyncadd [#allocation11 + $0x1], 4294966272  ;;  %1430 = vmatprep.subr.bf16.mxu1 %v1992_v53  ;;  %1446 = vmatprep.mubr.msk.bf16.mxu1 %vm1993_vm0, %v1992_v53  ;;  %v682_v58 = vld [vmem:[#allocation4 + $0x40] sm:$0xff]  ;;  %v683_v59 = vld [vmem:[#allocation4 + $0x48] sm:$0xff]  ;;  %p1788_p11 = scmp.ne.s32.totalorder %s2456_s22, %s2228_s2  ;;  %p1790_p0 = scmp.lt.u32.totalorder %s2456_s22, %s2651_s9 }
 0x5af   :  { %1431 = vmatpush3.bf16.msra.mxu1 %v682_v58  ;;  %v684_v60 = vld [vmem:[#allocation4 + $0x50] sm:$0xff]  ;;  %v685_v61 = vld [vmem:[#allocation4 + $0x58] sm:$0xff]  ;;  %v686_v62 = vld [vmem:[#allocation4 + $0x60] sm:$0xff]  ;;  %p1791_p1 = scmp.lt.u32.totalorder %s2228_s2, %s2228_s2 }
 0x5b0   :  { %1432 = vmatprep.subr.bf16.mxu1 %v1992_v53  ;;  %v687_v63 = vld [vmem:[#allocation4 + $0x68] sm:$0xff]  ;;  %v688_v8 = vld [vmem:[#allocation4 + $0x70] sm:$0xff]  ;;  %v689_v9 = vld [vmem:[#allocation4 + $0x78] sm:$0xff] }
 0x5b1   :  { %p1792_p9 = por %p1791_p1, %p1790_p0 }
 0x5b3   :  { %1433 = vmatpush3.bf16.msra.mxu1 %v683_v59  ;;  %p1794_p12 = por %p1792_p9, %p1766_p2 }
 0x5b4   :  { %1434 = vmatprep.subr.bf16.mxu1 %v1992_v53 }
 0x5b5   :  { %p1795_p13 = pnand %p1794_p12, %p1788_p11 }
 0x5b7   :  { %1435 = vmatpush3.bf16.msra.mxu1 %v684_v60 }
 0x5b8   :  { %1436 = vmatprep.subr.bf16.mxu1 %v1992_v53 }
 0x5bb   :  { %1437 = vmatpush3.bf16.msra.mxu1 %v685_v61 }
 0x5bc   :  { %1438 = vmatprep.subr.bf16.mxu1 %v1992_v53 }
 0x5bf   :  { %1439 = vmatpush3.bf16.msra.mxu1 %v686_v62 }
 0x5c0   :  { %1440 = vmatprep.subr.bf16.mxu1 %v1992_v53 }
 0x5c3   :  { %1441 = vmatpush3.bf16.msra.mxu1 %v687_v63 }
 0x5c4   :  { %1442 = vmatprep.subr.bf16.mxu1 %v1992_v53 }
 0x5c7   :  { %1443 = vmatpush3.bf16.msra.mxu1 %v688_v8 }
 0x5c8   :  { %1444 = vmatprep.subr.bf16.mxu1 %v1992_v53 }
 0x5cb   :  { %1445 = vmatpush3.bf16.msra.mxu1 %v689_v9 }
 0x5ce   :  { %1447 = vmatmul.mubr.bf16.vlgmr.msra.gmra.mrb[8].mxu1 %v2438_v41 }
 0x5cf   :  { %1798 = shalt.err (!%p1795_p13)  }
 0x5d0   :  { %1810 = shalt.err (!%p1757_p10)  }
 0x5d1   :  { %744 = dma.hbm_to_vmem [thread:$0]  %s2456_s22, 1024, %s2377_s30, [#allocation11 + $0x1] }
 0x6a1   :  { %v724_v10 = vpop.f32.mrb[8].mxu1 }
 0x6a2   :  { %v730_v11 = vmax.f32 %v724_v10, 0.0  ;;  %v1448_v12 = vpop.f32.mrb[9].mxu1 }
 0x6a3   :  { %v727_v13 = vpop.f32.mrb[10].mxu1 }
 0x6a4   :  { %v2509_v14 = vmul.f32 %v730_v11, %v730_v11  ;;  %v1449_v15 = vpop.f32.mrb[11].mxu1 }
 0x6a5   :  { %1960 = dma.done.wait [#allocation11], 1024 }
 0x6a6   :  { %1961 = vsyncadd [#allocation11], 4294966272  ;;  %1450 = vmatprep.subr.bf16.mxu0 %v1992_v53  ;;  %1466 = vmatprep.mubr.msk.bf16.mxu0 %vm1993_vm0, %v1992_v53  ;;  %v747_v16 = vld [vmem:[#allocation4] sm:$0xff]  ;;  %v748_v17 = vld [vmem:[#allocation4 + $0x8] sm:$0xff] }
 0x6a7   :  { %1451 = vmatpush3.bf16.msra.mxu0 %v747_v16  ;;  %v749_v18 = vld [vmem:[#allocation4 + $0x10] sm:$0xff]  ;;  %v750_v19 = vld [vmem:[#allocation4 + $0x18] sm:$0xff]  ;;  %v751_v0 = vld [vmem:[#allocation4 + $0x20] sm:$0xff] }
 0x6a8   :  { %1452 = vmatprep.subr.bf16.mxu0 %v1992_v53  ;;  %v752_v2 = vld [vmem:[#allocation4 + $0x28] sm:$0xff]  ;;  %v753_v3 = vld [vmem:[#allocation4 + $0x30] sm:$0xff]  ;;  %v754_v4 = vld [vmem:[#allocation4 + $0x38] sm:$0xff] }
 0x6ab   :  { %1453 = vmatpush3.bf16.msra.mxu0 %v748_v17 }
 0x6ac   :  { %1454 = vmatprep.subr.bf16.mxu0 %v1992_v53 }
 0x6af   :  { %1455 = vmatpush3.bf16.msra.mxu0 %v749_v18 }
 0x6b0   :  { %1456 = vmatprep.subr.bf16.mxu0 %v1992_v53 }
 0x6b3   :  { %1457 = vmatpush3.bf16.msra.mxu0 %v750_v19 }
 0x6b4   :  { %1458 = vmatprep.subr.bf16.mxu0 %v1992_v53 }
 0x6b7   :  { %1459 = vmatpush3.bf16.msra.mxu0 %v751_v0 }
 0x6b8   :  { %1460 = vmatprep.subr.bf16.mxu0 %v1992_v53 }
 0x6bb   :  { %1461 = vmatpush3.bf16.msra.mxu0 %v752_v2 }
 0x6bc   :  { %1462 = vmatprep.subr.bf16.mxu0 %v1992_v53 }
 0x6bf   :  { %1463 = vmatpush3.bf16.msra.mxu0 %v753_v3 }
 0x6c0   :  { %1464 = vmatprep.subr.bf16.mxu0 %v1992_v53 }
 0x6c3   :  { %1465 = vmatpush3.bf16.msra.mxu0 %v754_v4 }
 0x6c6   :  { %1467 = vmatmul.mubr.bf16.vlgmr.msra.gmra.mrb[12].mxu0 %v2438_v41 }
 0x799   :  { %v789_v5 = vpop.f32.mrb[12].mxu0 }
 0x79a   :  { %v795_v6 = vmax.f32 %v789_v5, 0.0  ;;  %v1468_v7 = vpop.f32.mrb[13].mxu0 }
 0x79b   :  { %v792_v23 = vpop.f32.mrb[14].mxu0 }
 0x79c   :  { %v2522_v20 = vmul.f32 %v795_v6, %v795_v6  ;;  %v1469_v21 = vpop.f32.mrb[15].mxu0 }
 0x79d   :  { %1962 = dma.done.wait [#allocation11 + $0x1], 1024 }
 0x79e   :  { %1963 = vsyncadd [#allocation11 + $0x1], 4294966272  ;;  %1470 = vmatprep.subr.bf16.mxu1 %v1992_v53  ;;  %1486 = vmatprep.mubr.msk.bf16.mxu1 %vm1993_vm0, %v1992_v53  ;;  %v800_v22 = vld [vmem:[#allocation4 + $0x40] sm:$0xff]  ;;  %v801_v24 = vld [vmem:[#allocation4 + $0x48] sm:$0xff]  ;;  %v855_v31 = vpack.c.bf16 %v2478_v56, %v2478_v56  ;;  %v856_v33 = vpack.c.bf16 %v2509_v14, %v2509_v14  ;;  %v857_v34 = vpack.c.bf16 %v2522_v20, %v2522_v20 }
 0x79f   :  { %1471 = vmatpush3.bf16.msra.mxu1 %v800_v22  ;;  %v802_v25 = vld [vmem:[#allocation4 + $0x50] sm:$0xff]  ;;  %v803_v26 = vld [vmem:[#allocation4 + $0x58] sm:$0xff]  ;;  %v804_v27 = vld [vmem:[#allocation4 + $0x60] sm:$0xff] }
 0x7a0   :  { %1472 = vmatprep.subr.bf16.mxu1 %v1992_v53  ;;  %v805_v28 = vld [vmem:[#allocation4 + $0x68] sm:$0xff]  ;;  %v806_v29 = vld [vmem:[#allocation4 + $0x70] sm:$0xff]  ;;  %v807_v30 = vld [vmem:[#allocation4 + $0x78] sm:$0xff] }
 0x7a3   :  { %1473 = vmatpush3.bf16.msra.mxu1 %v801_v24 }
 0x7a4   :  { %1474 = vmatprep.subr.bf16.mxu1 %v1992_v53 }
 0x7a7   :  { %1475 = vmatpush3.bf16.msra.mxu1 %v802_v25 }
 0x7a8   :  { %1476 = vmatprep.subr.bf16.mxu1 %v1992_v53 }
 0x7ab   :  { %1477 = vmatpush3.bf16.msra.mxu1 %v803_v26 }
 0x7ac   :  { %1478 = vmatprep.subr.bf16.mxu1 %v1992_v53 }
 0x7af   :  { %1479 = vmatpush3.bf16.msra.mxu1 %v804_v27 }
 0x7b0   :  { %1480 = vmatprep.subr.bf16.mxu1 %v1992_v53 }
 0x7b3   :  { %1481 = vmatpush3.bf16.msra.mxu1 %v805_v28 }
 0x7b4   :  { %1482 = vmatprep.subr.bf16.mxu1 %v1992_v53 }
 0x7b7   :  { %1483 = vmatpush3.bf16.msra.mxu1 %v806_v29 }
 0x7b8   :  { %1484 = vmatprep.subr.bf16.mxu1 %v1992_v53 }
 0x7bb   :  { %1485 = vmatpush3.bf16.msra.mxu1 %v807_v30 }
 0x7be   :  { %1487 = vmatmul.mubr.bf16.vlgmr.msra.gmra.mrb[12].mxu1 %v2438_v41 }
 0x891   :  { %v842_v35 = vpop.f32.mrb[12].mxu1 }
 0x892   :  { %v848_v36 = vmax.f32 %v842_v35, 0.0  ;;  %v1488_v37 = vpop.f32.mrb[13].mxu1 }
 0x893   :  { %v845_v38 = vpop.f32.mrb[14].mxu1 }
 0x894   :  { %v2541_v43 = vmul.f32 %v848_v36, %v848_v36  ;;  %v1489_v44 = vpop.f32.mrb[15].mxu1 }
 0x896   :  { %v858_v45 = vpack.c.bf16 %v2541_v43, %v2541_v43 }
 0x897   :  { %1964 = dma.done.wait [#allocation12], 5120 }
 0x898   :  { %1965 = vsyncadd [#allocation12], 4294962176  ;;  %1490 = vmatprep.subr.bf16.mxu0 %v1992_v53  ;;  %1506 = vmatprep.mubr.msk.bf16.mxu0 %vm1993_vm0, %v1992_v53  ;;  %1032 = vst [vmem:[#allocation30] sm:$0xff] %v2294_v39  ;;  %v863_v41 = vld [vmem:[#allocation5] sm:$0xff]  ;;  %v864_v46 = vld [vmem:[#allocation5 + $0x8] sm:$0xff]  ;;  %s1995_s9 = smov [#allocation25]  }
 0x899   :  { %1033 = vst [vmem:[#allocation31] sm:$0xff] %v2427_v32  ;;  %981 = vmatprep.mubr.bf16.mxu1 %v856_v33  ;;  %1491 = vmatpush3.bf16.msra.mxu0 %v863_v41  ;;  %v879_v47 = vld [vmem:[#allocation5 + $0x80] sm:$0xff]  ;;  %v880_v49 = vld [vmem:[#allocation5 + $0x88] sm:$0xff]  ;;  %v865_v51 = vld [vmem:[#allocation5 + $0x10] sm:$0xff]  ;;  %s1050_s2 = sshll.u32 %s1995_s9, 4  ;;  %s1996_s19 = smov [#allocation28]   ;;  %s1051_s2 = int_to_ptr.vmem [resolvable:$true] %s1050_s2 }
 0x89a   :  { %1492 = vmatprep.subr.bf16.mxu0 %v1992_v53  ;;  %1286 = vmatprep.subr.bf16.mxu1 %v879_v47  ;;  %v871_v48 = vld [vmem:[#allocation5 + $0x40] sm:$0xff]  ;;  %v872_v50 = vld [vmem:[#allocation5 + $0x48] sm:$0xff]  ;;  %v881_v39 = vld [vmem:[#allocation5 + $0x90] sm:$0xff]  ;;  %s1070_s30 = sshll.u32 %s1996_s19, 4  ;;  %s1812_s3 = scalar_lea.vmem %s1051_s2, 128  ;;  %s1071_s30 = int_to_ptr.vmem [resolvable:$true] %s1070_s30 }
 0x89b   :  { %1287 = vmatpush3.bf16.msra.mxu1 %v871_v48  ;;  %v873_v32 = vld [vmem:[#allocation5 + $0x50] sm:$0xff]  ;;  %v866_v52 = vld [vmem:[#allocation5 + $0x18] sm:$0xff]  ;;  %v867_v57 = vld [vmem:[#allocation5 + $0x20] sm:$0xff]  ;;  %p1813_p6 = scmp.ne.s32.totalorder %s1051_s2, %s1812_s3  ;;  %p1817_p8 = scmp.lt.s32.totalorder %s1051_s2, %s1051_s2 }
 0x89c   :  { %1288 = vmatprep.subr.bf16.mxu1 %v880_v49  ;;  %v882_v54 = vld [vmem:[#allocation5 + $0x98] sm:$0xff]  ;;  %v883_v58 = vld [vmem:[#allocation5 + $0xa0] sm:$0xff]  ;;  %v868_v60 = vld [vmem:[#allocation5 + $0x28] sm:$0xff]  ;;  %p1818_p10 = scmp.lt.s32.totalorder %s1812_s3, %s1812_s3 }
 0x89d   :  { %1493 = vmatpush3.bf16.msra.mxu0 %v864_v46  ;;  %v874_v55 = vld [vmem:[#allocation5 + $0x58] sm:$0xff]  ;;  %v875_v59 = vld [vmem:[#allocation5 + $0x60] sm:$0xff]  ;;  %v884_v61 = vld [vmem:[#allocation5 + $0xa8] sm:$0xff] }
 0x89e   :  { %1494 = vmatprep.subr.bf16.mxu0 %v1992_v53  ;;  %v876_v62 = vld [vmem:[#allocation5 + $0x68] sm:$0xff]  ;;  %v869_v63 = vld [vmem:[#allocation5 + $0x30] sm:$0xff]  ;;  %v870_v10 = vld [vmem:[#allocation5 + $0x38] sm:$0xff]  ;;  %p1819_p2 = por %p1818_p10, %p1817_p8 }
 0x89f   :  { %1289 = vmatpush3.bf16.msra.mxu1 %v872_v50  ;;  %v885_v8 = vld [vmem:[#allocation5 + $0xb0] sm:$0xff]  ;;  %v886_v11 = vld [vmem:[#allocation5 + $0xb8] sm:$0xff]  ;;  %v895_v12 = vld [vmem:[#allocation5 + $0x100] sm:$0xff] }
 0x8a0   :  { %1290 = vmatprep.subr.bf16.mxu1 %v881_v39  ;;  %v877_v9 = vld [vmem:[#allocation5 + $0x70] sm:$0xff]  ;;  %v878_v13 = vld [vmem:[#allocation5 + $0x78] sm:$0xff]  ;;  %v887_v14 = vld [vmem:[#allocation5 + $0xc0] sm:$0xff]  ;;  %p1820_p3 = pnand %p1819_p2, %p1813_p6 }
 0x8a1   :  { %1495 = vmatpush3.bf16.msra.mxu0 %v865_v51  ;;  %v896_v15 = vld [vmem:[#allocation5 + $0x108] sm:$0xff]  ;;  %v897_v16 = vld [vmem:[#allocation5 + $0x110] sm:$0xff]  ;;  %v898_v18 = vld [vmem:[#allocation5 + $0x118] sm:$0xff] }
 0x8a2   :  { %1496 = vmatprep.subr.bf16.mxu0 %v1992_v53  ;;  %v889_v17 = vld [vmem:[#allocation5 + $0xd0] sm:$0xff]  ;;  %v890_v40 = vld [vmem:[#allocation5 + $0xd8] sm:$0xff]  ;;  %v891_v19 = vld [vmem:[#allocation5 + $0xe0] sm:$0xff] }
 0x8a3   :  { %1291 = vmatpush3.bf16.msra.mxu1 %v873_v32  ;;  %v900_v0 = vld [vmem:[#allocation5 + $0x128] sm:$0xff]  ;;  %v901_v3 = vld [vmem:[#allocation5 + $0x130] sm:$0xff]  ;;  %v902_v4 = vld [vmem:[#allocation5 + $0x138] sm:$0xff] }
 0x8a4   :  { %1292 = vmatprep.subr.bf16.mxu1 %v882_v54  ;;  %v892_v2 = vld [vmem:[#allocation5 + $0xe8] sm:$0xff]  ;;  %v893_v56 = vld [vmem:[#allocation5 + $0xf0] sm:$0xff]  ;;  %v894_v5 = vld [vmem:[#allocation5 + $0xf8] sm:$0xff] }
 0x8a5   :  { %1497 = vmatpush3.bf16.msra.mxu0 %v866_v52 }
 0x8a6   :  { %1498 = vmatprep.subr.bf16.mxu0 %v1992_v53 }
 0x8a7   :  { %1293 = vmatpush3.bf16.msra.mxu1 %v874_v55 }
 0x8a8   :  { %1294 = vmatprep.subr.bf16.mxu1 %v883_v58 }
 0x8a9   :  { %1499 = vmatpush3.bf16.msra.mxu0 %v867_v57 }
 0x8aa   :  { %1500 = vmatprep.subr.bf16.mxu0 %v1992_v53 }
 0x8ab   :  { %1295 = vmatpush3.bf16.msra.mxu1 %v875_v59 }
 0x8ac   :  { %1296 = vmatprep.subr.bf16.mxu1 %v884_v61 }
 0x8ad   :  { %1501 = vmatpush3.bf16.msra.mxu0 %v868_v60 }
 0x8ae   :  { %1502 = vmatprep.subr.bf16.mxu0 %v1992_v53 }
 0x8af   :  { %1297 = vmatpush3.bf16.msra.mxu1 %v876_v62 }
 0x8b0   :  { %1298 = vmatprep.subr.bf16.mxu1 %v885_v8 }
 0x8b1   :  { %1503 = vmatpush3.bf16.msra.mxu0 %v869_v63 }
 0x8b2   :  { %1504 = vmatprep.subr.bf16.mxu0 %v1992_v53  ;;  %v888_v53 = vld [vmem:[#allocation5 + $0xc8] sm:$0xff] }
 0x8b3   :  { %1299 = vmatpush3.bf16.msra.mxu1 %v877_v9 }
 0x8b4   :  { %1300 = vmatprep.subr.bf16.mxu1 %v886_v11 }
 0x8b5   :  { %1505 = vmatpush3.bf16.msra.mxu0 %v870_v10 }
 0x8b6   :  { %1308 = vmatprep.subr.bf16.mxu0 %v895_v12 }
 0x8b7   :  { %1301 = vmatpush3.bf16.msra.mxu1 %v878_v13 }
 0x8b8   :  { %1507 = vmatmul.mubr.bf16.vlgmr.msra.gmra.mrb[16].mxu0 %v600_v42  ;;  %v899_v42 = vld [vmem:[#allocation5 + $0x120] sm:$0xff] }
 0x8b9   :  { %1309 = vmatpush3.bf16.msra.mxu0 %v887_v14  ;;  %1021 = vmatprep.mubr.bf16.mxu0 %v858_v45 }
 0x8ba   :  { %1310 = vmatprep.subr.bf16.mxu0 %v896_v15  ;;  %982 = vmatmul.mubr.bf16.vlgmr.msra.gmra.mrb[16].mxu1 %v855_v31 }
 0x8bd   :  { %1311 = vmatpush3.bf16.msra.mxu0 %v888_v53 }
 0x8be   :  { %1312 = vmatprep.subr.bf16.mxu0 %v897_v16 }
 0x8c1   :  { %1313 = vmatpush3.bf16.msra.mxu0 %v889_v17 }
 0x8c2   :  { %1314 = vmatprep.subr.bf16.mxu0 %v898_v18 }
 0x8c5   :  { %1315 = vmatpush3.bf16.msra.mxu0 %v890_v40 }
 0x8c6   :  { %1316 = vmatprep.subr.bf16.mxu0 %v899_v42 }
 0x8c9   :  { %1317 = vmatpush3.bf16.msra.mxu0 %v891_v19 }
 0x8ca   :  { %1318 = vmatprep.subr.bf16.mxu0 %v900_v0 }
 0x8cd   :  { %1319 = vmatpush3.bf16.msra.mxu0 %v892_v2 }
 0x8ce   :  { %1320 = vmatprep.subr.bf16.mxu0 %v901_v3 }
 0x8d1   :  { %1321 = vmatpush3.bf16.msra.mxu0 %v893_v56 }
 0x8d2   :  { %1322 = vmatprep.subr.bf16.mxu0 %v902_v4 }
 0x8d5   :  { %1323 = vmatpush3.bf16.msra.mxu0 %v894_v5 }
 0x8d8   :  { %1022 = vmatmul.mubr.bf16.vlgmr.msra.gmra.mrb[20].mxu0 %v857_v34 }
 0x8d9   :  { %1823 = shalt.err (!%p1820_p3)
}
 0x8da   :  { %s1824_s10 = scalar_lea.hbm %s2654_s12, 128 }
 0x8db   :  { %p1825_p4 = scmp.ne.s32.totalorder %s2654_s12, %s1824_s10  ;;  %p1828_p5 = scmp.lt.u32.totalorder %s1824_s10, %s2654_s12 }
 0x8dd   :  { %p1830_p7 = pnand %p1828_p5, %p1825_p4 }
 0x8df   :  { %1833 = shalt.err (!%p1830_p7)
}
 0x8e0   :  { %1053 = dma.vmem_to_hbm [thread:$0]  %s1051_s2, 128, %s2654_s12, [#allocation26]  }
 0x8e1   :  { %s1834_s25 = scalar_lea.vmem %s1071_s30, 128  ;;  %p1839_p0 = scmp.lt.s32.totalorder %s1071_s30, %s1071_s30 }
 0x8e2   :  { %p1835_p11 = scmp.ne.s32.totalorder %s1071_s30, %s1834_s25  ;;  %p1840_p1 = scmp.lt.s32.totalorder %s1834_s25, %s1834_s25 }
 0x8e4   :  { %p1841_p9 = por %p1840_p1, %p1839_p0 }
 0x8e6   :  { %p1842_p12 = pnand %p1841_p9, %p1835_p11 }
 0x8e8   :  { %1845 = shalt.err (!%p1842_p12)
}
 0x8e9   :  { %s1846_s29 = scalar_lea.hbm %s2656_s14, 128 }
 0x8ea   :  { %p1847_p13 = scmp.ne.s32.totalorder %s2656_s14, %s1846_s29  ;;  %p1850_p6 = scmp.lt.u32.totalorder %s1846_s29, %s2656_s14 }
 0x8ec   :  { %p1852_p8 = pnand %p1850_p6, %p1847_p13 }
 0x8ee   :  { %1855 = shalt.err (!%p1852_p8)
}
 0x8ef   :  { %1073 = dma.vmem_to_hbm [thread:$0]  %s1071_s30, 128, %s2656_s14, [#allocation29]  }
 0x8f0   :  { %s1997_s0 = smov [#allocation27]  }
 0x8f1   :  { %s1060_s18 = sshll.u32 %s1997_s0, 4  ;;  %s1061_s18 = int_to_ptr.vmem [resolvable:$true] %s1060_s18 }
 0x8f2   :  { %s1856_s9 = scalar_lea.vmem %s1061_s18, 128  ;;  %p1861_p2 = scmp.lt.s32.totalorder %s1061_s18, %s1061_s18 }
 0x8f3   :  { %p1857_p10 = scmp.ne.s32.totalorder %s1061_s18, %s1856_s9  ;;  %p1862_p3 = scmp.lt.s32.totalorder %s1856_s9, %s1856_s9 }
 0x8f5   :  { %p1863_p4 = por %p1862_p3, %p1861_p2 }
 0x8f7   :  { %p1864_p5 = pnand %p1863_p4, %p1857_p10 }
 0x8f9   :  { %1867 = shalt.err (!%p1864_p5)
}
 0x8fa   :  { %s1868_s3 = scalar_lea.hbm %s2655_s13, 128 }
 0x8fb   :  { %p1869_p7 = scmp.ne.s32.totalorder %s2655_s13, %s1868_s3  ;;  %p1872_p11 = scmp.lt.u32.totalorder %s1868_s3, %s2655_s13 }
 0x8fd   :  { %p1874_p0 = pnand %p1872_p11, %p1869_p7 }
 0x8ff   :  { %1877 = shalt.err (!%p1874_p0)
}
 0x900   :  { %1063 = dma.vmem_to_hbm [thread:$0]  %s1061_s18, 128, %s2655_s13, [#allocation26]  }
 0x901   :  { %s1998_s1 = smov [#allocation30]   ;;  %s1999_s23 = smov [#allocation31]  }
 0x902   :  { %s1080_s17 = sshll.u32 %s1998_s1, 4  ;;  %s1090_s4 = sshll.u32 %s1999_s23, 4  ;;  %s1081_s17 = int_to_ptr.vmem [resolvable:$true] %s1080_s17  ;;  %s1091_s4 = int_to_ptr.vmem [resolvable:$true] %s1090_s4 }
 0x903   :  { %s1878_s5 = scalar_lea.vmem %s1081_s17, 128  ;;  %p1883_p9 = scmp.lt.s32.totalorder %s1081_s17, %s1081_s17 }
 0x904   :  { %p1879_p1 = scmp.ne.s32.totalorder %s1081_s17, %s1878_s5  ;;  %p1884_p12 = scmp.lt.s32.totalorder %s1878_s5, %s1878_s5 }
 0x906   :  { %p1885_p13 = por %p1884_p12, %p1883_p9 }
 0x908   :  { %p1886_p6 = pnand %p1885_p13, %p1879_p1 }
 0x90a   :  { %1889 = shalt.err (!%p1886_p6)
}
 0x90b   :  { %s1890_s28 = scalar_lea.hbm %s2657_s15, 128 }
 0x90c   :  { %p1891_p8 = scmp.ne.s32.totalorder %s2657_s15, %s1890_s28  ;;  %p1894_p10 = scmp.lt.u32.totalorder %s1890_s28, %s2657_s15 }
 0x90e   :  { %p1896_p2 = pnand %p1894_p10, %p1891_p8 }
 0x910   :  { %1899 = shalt.err (!%p1896_p2)
}
 0x911   :  { %1083 = dma.vmem_to_hbm [thread:$0]  %s1081_s17, 128, %s2657_s15, [#allocation29]  }
 0x912   :  { %s1900_s12 = scalar_lea.vmem %s1091_s4, 128  ;;  %p1905_p4 = scmp.lt.s32.totalorder %s1091_s4, %s1091_s4 }
 0x913   :  { %p1901_p3 = scmp.ne.s32.totalorder %s1091_s4, %s1900_s12  ;;  %p1906_p5 = scmp.lt.s32.totalorder %s1900_s12, %s1900_s12 }
 0x915   :  { %p1907_p7 = por %p1906_p5, %p1905_p4 }
 0x917   :  { %p1908_p11 = pnand %p1907_p7, %p1901_p3 }
 0x919   :  { %1911 = shalt.err (!%p1908_p11)
}
 0x91a   :  { %s1912_s18 = scalar_lea.hbm %s2658_s16, 128 }
 0x91b   :  { %p1913_p0 = scmp.ne.s32.totalorder %s2658_s16, %s1912_s18  ;;  %p1916_p1 = scmp.lt.u32.totalorder %s1912_s18, %s2658_s16 }
 0x91d   :  { %p1918_p9 = pnand %p1916_p1, %p1913_p0 }
 0x91f   :  { %1921 = shalt.err (!%p1918_p9)
}
 0x920   :  { %1093 = dma.vmem_to_hbm [thread:$0]  %s1091_s4, 128, %s2658_s16, [#allocation32]  }
 0x921   :  { %s2000_s16 = smov [#allocation24]  }
 0x922   :  { %s1040_s21 = sshll.u32 %s2000_s16, 4  ;;  %s1041_s21 = int_to_ptr.vmem [resolvable:$true] %s1040_s21 }
 0x923   :  { %s1922_s10 = scalar_lea.vmem %s1041_s21, 128  ;;  %p1927_p13 = scmp.lt.s32.totalorder %s1041_s21, %s1041_s21 }
 0x924   :  { %p1923_p12 = scmp.ne.s32.totalorder %s1041_s21, %s1922_s10  ;;  %p1928_p6 = scmp.lt.s32.totalorder %s1922_s10, %s1922_s10 }
 0x926   :  { %p1929_p8 = por %p1928_p6, %p1927_p13 }
 0x928   :  { %p1930_p10 = pnand %p1929_p8, %p1923_p12 }
 0x98b   :  { %v937_v6 = vpop.f32.mrb[16].mxu0 }
 0x98c   :  { %v1508_v7 = vpop.f32.mrb[17].mxu0  ;;  %v1196_v26 = vmul.f32 -1.442695, %v937_v6 }
 0x98d   :  { %v940_v23 = vpop.f32.mrb[18].mxu0  ;;  %v1302_v21 = vpop.f32.mrb[16].mxu1 }
 0x98e   :  { %v1509_v20 = vpop.f32.mrb[19].mxu0  ;;  %v1303_v22 = vpop.f32.mrb[17].mxu1  ;;  %1557 = vpow2.f32 %v1196_v26 }
 0x98f   :  { %v1304_v24 = vadd.f32 %v1303_v22, %v1302_v21  ;;  %v1305_v25 = vpop.f32.mrb[18].mxu1 }
 0x990   :  { %v1306_v27 = vpop.f32.mrb[19].mxu1 }
 0x998   :  { %v1558_v28 = vpop.eup %1557 }
 0x999   :  { %v946_v29 = vadd.f32 1.0, %v1558_v28 }
 0x99b   :  { %1559 = vrcp.f32 %v946_v29 }
 0x9a5   :  { %v1560_v37 = vpop.eup %1559 }
 0x9ab   :  { %v1324_v30 = vpop.f32.mrb[20].mxu0 }
 0x9ac   :  { %v1325_v31 = vpop.f32.mrb[21].mxu0 }
 0x9ad   :  { %v1326_v33 = vadd.f32 %v1325_v31, %v1324_v30  ;;  %v1327_v34 = vpop.f32.mrb[22].mxu0 }
 0x9ae   :  { %v1328_v35 = vpop.f32.mrb[23].mxu0 }
 0x9af   :  { %v1024_v36 = vadd.f32 %v1326_v33, %v1304_v24 }
 0x9b1   :  { %v1029_v38 = vmul.f32 %v1560_v37, %v1024_v36 }
 0x9b3   :  { %v1030_v43 = vadd.f32 %v1029_v38, %v2372_v1 }
 0x9b5   :  { %1031 = vst [vmem:[#allocation24] sm:$0xff] %v1030_v43 }
 0x9b6   :  { %1933 = shalt.err (!%p1930_p10)
}
 0x9b7   :  { %s1934_s26 = scalar_lea.hbm %s2653_s11, 128 }
 0x9b8   :  { %p1935_p2 = scmp.ne.s32.totalorder %s2653_s11, %s1934_s26  ;;  %p1938_p3 = scmp.lt.u32.totalorder %s1934_s26, %s2653_s11 }
 0x9ba   :  { %p1940_p4 = pnand %p1938_p3, %p1935_p2 }
 0x9bc   :  { %1943 = shalt.err (!%p1940_p4)
}
 0x9bd   :  { %1043 = dma.vmem_to_hbm [thread:$0]  %s1041_s21, 128, %s2653_s11, [#allocation15]  }
 0x9be   :  { %1966 = dma.done.wait [#allocation15], 128  }
 0x9bf   :  { %1967 = vsyncadd [#allocation15], 4294967168 }
 0x9c0   :  { %1968 = dma.done.wait [#allocation26], 256  }
 0x9c1   :  { %1969 = vsyncadd [#allocation26], 4294967040 }
 0x9c2   :  { %1970 = dma.done.wait [#allocation29], 256  }
 0x9c3   :  { %1971 = vsyncadd [#allocation29], 4294967040 }
 0x9c4   :  { %1972 = dma.done.wait [#allocation32], 128  }
 0x9c5   :  { %1973 = vsyncadd [#allocation32], 4294967168 }
 0x9c6   :  { %1112 = vsyncpa [#allocation14], 1 }
 0x9c7   :  { %1113 = vsyncpa [#allocation17], 1 }
 0x9c8   :  { %1114 = vsyncpa [#allocation20], 1 }
 0x9c9   :  { %1115 = vsyncpa [#allocation23], 1 }
 0x9ca   :  { %1116 = vsyncpa [#allocation15], 1 }
 0x9cb   :  { %1117 = vsyncpa [#allocation26], 1 }
 0x9cc   :  { %1118 = vsyncpa [#allocation29], 1 }
 0x9cd   :  { %1119 = vsyncpa [#allocation32], 1 }
 0x9ce   :  { %1120 = vsyncmov [#allocation9] }
 0x9d1   :  { %s1121_s24 = vpop.sfrf %1120 }
 0x9d2   :  { %p1197_p5 = scmp.ne.s32.totalorder %s1121_s24, 0 }
 0x9d4   :  { %1125 = shalt.err (%p1197_p5)  }
 0x9d5   :  { %1127 = vsyncmov [#allocation9 + $0x1] }
 0x9d8   :  { %s1128_s11 = vpop.sfrf %1127 }
 0x9d9   :  { %p1198_p7 = scmp.ne.s32.totalorder %s1128_s11, 0 }
 0x9db   :  { %1132 = shalt.err (%p1198_p7)  }
 0x9dc   :  { %1133 = vsyncmov [#allocation10] }
 0x9df   :  { %s1134_s28 = vpop.sfrf %1133 }
 0x9e0   :  { %p1199_p11 = scmp.ne.s32.totalorder %s1134_s28, 0 }
 0x9e2   :  { %1138 = shalt.err (%p1199_p11)  }
 0x9e3   :  { %1140 = vsyncmov [#allocation10 + $0x1] }
 0x9e6   :  { %s1141_s29 = vpop.sfrf %1140 }
 0x9e7   :  { %p1200_p0 = scmp.ne.s32.totalorder %s1141_s29, 0 }
 0x9e9   :  { %1145 = shalt.err (%p1200_p0)  }
 0x9ea   :  { %1146 = vsyncmov [#allocation11] }
 0x9ed   :  { %s1147_s20 = vpop.sfrf %1146 }
 0x9ee   :  { %p1201_p1 = scmp.ne.s32.totalorder %s1147_s20, 0 }
 0x9f0   :  { %1151 = shalt.err (%p1201_p1)  }
 0x9f1   :  { %1153 = vsyncmov [#allocation11 + $0x1] }
 0x9f4   :  { %s1154_s13 = vpop.sfrf %1153 }
 0x9f5   :  { %p1202_p9 = scmp.ne.s32.totalorder %s1154_s13, 0 }
 0x9f7   :  { %1158 = shalt.err (%p1202_p9)  }
 0x9f8   :  { %1159 = vsyncmov [#allocation12] }
 0x9fb   :  { %s1160_s7 = vpop.sfrf %1159 }
 0x9fc   :  { %p1203_p12 = scmp.ne.s32.totalorder %s1160_s7, 0 }
 0x9fe   :  { %1164 = shalt.err (%p1203_p12)  }
 0x9ff   :  { %1166 = vsyncmov [#allocation12 + $0x1] }
 0xa02   :  { %s1167_s22 = vpop.sfrf %1166 }
 0xa03   :  { %p1204_p13 = scmp.ne.s32.totalorder %s1167_s22, 0 }
 0xa05   :  { %1171 = shalt.err (%p1204_p13)  }

</bundles_post_ra>
